<compile_context>
chip_gen: v5e
topology: v5e:2x2
jax: 0.10.0
libtpu: 0.0.40
codegen_flags: <defaults>
</compile_context>

<pallas_src>
import jax
import jax.numpy as jnp
from jax import lax
from jax.experimental import pallas as pl
from jax.experimental.pallas import tpu as pltpu

_BN_EPS = 1e-5


def _vmem_limit_bytes():
    """Generation-aware scoped-VMEM limit (3/4 of physical, capped at 96 MiB)."""
    cap = 64 * 1024 * 1024                      # v7x per-TensorCore floor
    try:
        info = pltpu.get_tpu_info()
        cap = int(getattr(info, "vmem_capacity_bytes", cap)) or cap
    except Exception:
        pass
    return int(min(cap * 3 // 4, 96 * 1024 * 1024))


# --------------------------------------------------------------------------------------
# Fused kernel: one grid step per batch image.
#   stage 1: x1 = convT(bottom) + bias + left                  (dilated-input 3x3 conv)
#   stage 2: y1 = relu(conv3x3(x1) * s1 + b1)                  (BN folded)
#   stage 3: out = relu(conv3x3(y1) * s2 + b2)                 (BN folded)
# Each conv is computed row-by-row: for output row y, 9 shifted (W, Cin) slices of the
# halo'd VMEM activation feed 9 accumulating bf16 MXU dots with f32 accumulation.
# --------------------------------------------------------------------------------------
def _unet_up2_kernel(dil_ref, left_ref, wt_ref, w1_ref, w2_ref,
                     ub_ref, s1_ref, b1_ref, s2_ref, b2_ref,
                     out_ref, x1_ref, y1_ref):
    f32 = jnp.float32
    cdt = jnp.bfloat16

    H = out_ref.shape[0]
    W = out_ref.shape[1]
    cl = left_ref.shape[-1]
    cr = out_ref.shape[-1]

    # Zero the halo'd inter-stage scratches (borders provide the conv zero-padding).
    x1_ref[...] = jnp.zeros_like(x1_ref)
    y1_ref[...] = jnp.zeros_like(y1_ref)

    # Hoist the per-tap weight matrices and epilogue vectors out of the row loops.
    wt = [wt_ref[t] for t in range(9)]          # (Cb, Cl)  flipped convT taps
    w1 = [w1_ref[t] for t in range(9)]          # (Cl, Cl)
    w2 = [w2_ref[t] for t in range(9)]          # (Cl, Cr)
    ub = ub_ref[...]                            # (1, Cl)  convT bias
    s1 = s1_ref[...]; b1 = b1_ref[...]          # (1, Cl)
    s2 = s2_ref[...]; b2 = b2_ref[...]          # (1, Cr)

    # ---- stage 1: ConvTranspose2d as a flipped 3x3 conv over the zero-dilated input,
    #      fused with bias + `left` skip-add.  Result -> interior of x1 scratch (f32).
    def s1_row(y, c):
        acc = jnp.zeros((W, cl), f32)
        for a in range(3):
            for b in range(3):
                lhs = dil_ref[y + a, pl.ds(b, W), :]                 # (W, Cb) bf16
                acc = acc + jnp.dot(lhs, wt[a * 3 + b],
                                    preferred_element_type=f32)
        row = acc + ub + left_ref[y, :, :].astype(f32)
        x1_ref[y + 1, pl.ds(1, W), :] = row
        return c

    lax.fori_loop(0, H, s1_row, 0)

    # ---- stage 2: Conv3x3(Cl->Cl, pad=1) + BN + ReLU  -> interior of y1 scratch (f32).
    def s2_row(y, c):
        acc = jnp.zeros((W, cl), f32)
        for a in range(3):
            for b in range(3):
                lhs = x1_ref[y + a, pl.ds(b, W), :].astype(cdt)      # (W, Cl)
                acc = acc + jnp.dot(lhs, w1[a * 3 + b],
                                    preferred_element_type=f32)
        y1_ref[y + 1, pl.ds(1, W), :] = jnp.maximum(acc * s1 + b1, 0.0)
        return c

    lax.fori_loop(0, H, s2_row, 0)

    # ---- stage 3: Conv3x3(Cl->Cr, pad=1) + BN + ReLU  -> output block.
    def s3_row(y, c):
        acc = jnp.zeros((W, cr), f32)
        for a in range(3):
            for b in range(3):
                lhs = y1_ref[y + a, pl.ds(b, W), :].astype(cdt)      # (W, Cl)
                acc = acc + jnp.dot(lhs, w2[a * 3 + b],
                                    preferred_element_type=f32)
        out_ref[y, :, :] = jnp.maximum(acc * s2 + b2, 0.0).astype(out_ref.dtype)
        return c

    lax.fori_loop(0, H, s3_row, 0)


# --------------------------------------------------------------------------------------
# JAX glue: layout, per-tap weight matrices, BN folding, pallas_call.
# --------------------------------------------------------------------------------------
def _conv_taps(w_oihw):
    """Conv2d weight (Cout, Cin, 3, 3) -> (9, Cin, Cout), tap index = ky*3 + kx."""
    cout, cin = w_oihw.shape[:2]
    return jnp.transpose(w_oihw, (2, 3, 1, 0)).reshape(9, cin, cout)


def _convT_taps(w_iohw):
    """ConvTranspose2d weight (Cin, Cout, 3, 3) -> flipped-kernel (9, Cin, Cout)."""
    cin, cout = w_iohw.shape[:2]
    w_flip = jnp.flip(w_iohw, axis=(2, 3))
    return jnp.transpose(w_flip, (2, 3, 0, 1)).reshape(9, cin, cout)


def _fold_bn(conv_bias, gamma, beta, mean, var):
    scale = gamma / jnp.sqrt(var + _BN_EPS)
    shift = beta + (conv_bias - mean) * scale
    return (scale.reshape(1, -1).astype(jnp.float32),
            shift.reshape(1, -1).astype(jnp.float32))


def unet_up2_forward(left, bottom, params):
    """left: (N, Cl, H, W), bottom: (N, Cb, h, w) NCHW with H = 2h+1, W = 2w+1."""
    n, cl, H, W = left.shape
    _, cb, h, w = bottom.shape
    assert H == 2 * h + 1 and W == 2 * w + 1
    cr = params["c2_w"].shape[0]
    cdt = jnp.bfloat16                           # MXU operand dtype (f32 accumulate)

    left_nhwc = jnp.transpose(left, (0, 2, 3, 1)).astype(cdt)        # (N, H, W, Cl)
    bottom_nhwc = jnp.transpose(bottom, (0, 2, 3, 1)).astype(cdt)    # (N, h, w, Cb)

    # Zero-dilated (stride-2 interior) + edge-2 padded bottom in ONE lax.pad op:
    # shape (N, 2h+3, 2w+3, Cb) == (N, H+2, W+2, Cb).  This is the only "extra" HBM
    # tensor; everything else (taps, x1, y1) now lives purely in VMEM.
    dil_pad = lax.pad(bottom_nhwc, jnp.array(0, dtype=cdt),
                      ((0, 0, 0), (2, 2, 1), (2, 2, 1), (0, 0, 0)))

    wt = _convT_taps(params["up_w"]).astype(cdt)                     # (9, Cb, Cl)
    w1 = _conv_taps(params["c1_w"]).astype(cdt)                      # (9, Cl, Cl)
    w2 = _conv_taps(params["c2_w"]).astype(cdt)                      # (9, Cl, Cr)

    ub = params["up_b"].reshape(1, cl).astype(jnp.float32)
    s1, b1 = _fold_bn(params["c1_b"], params["bn1_g"], params["bn1_b"],
                      params["bn1_m"], params["bn1_v"])
    s2, b2 = _fold_bn(params["c2_b"], params["bn2_g"], params["bn2_b"],
                      params["bn2_m"], params["bn2_v"])

    out_nhwc = pl.pallas_call(
        _unet_up2_kernel,
        out_shape=jax.ShapeDtypeStruct((n, H, W, cr), jnp.float32),
        grid_spec=pltpu.PrefetchScalarGridSpec(
            num_scalar_prefetch=0,
            grid=(n,),
            in_specs=[
                pl.BlockSpec((None, H + 2, W + 2, cb), lambda i: (i, 0, 0, 0)),
                pl.BlockSpec((None, H, W, cl), lambda i: (i, 0, 0, 0)),
                pl.BlockSpec((9, cb, cl), lambda i: (0, 0, 0)),
                pl.BlockSpec((9, cl, cl), lambda i: (0, 0, 0)),
                pl.BlockSpec((9, cl, cr), lambda i: (0, 0, 0)),
                pl.BlockSpec((1, cl), lambda i: (0, 0)),
                pl.BlockSpec((1, cl), lambda i: (0, 0)),
                pl.BlockSpec((1, cl), lambda i: (0, 0)),
                pl.BlockSpec((1, cr), lambda i: (0, 0)),
                pl.BlockSpec((1, cr), lambda i: (0, 0)),
            ],
            out_specs=pl.BlockSpec((None, H, W, cr), lambda i: (i, 0, 0, 0)),
            scratch_shapes=[
                pltpu.VMEM((H + 2, W + 2, cl), jnp.float32),   # x1 (halo'd, f32)
                pltpu.VMEM((H + 2, W + 2, cl), jnp.float32),   # y1 (halo'd, f32)
            ],
        ),
        compiler_params=pltpu.CompilerParams(
            dimension_semantics=("parallel",),
            vmem_limit_bytes=_vmem_limit_bytes(),
        ),
    )(dil_pad, left_nhwc, wt, w1, w2, ub, s1, b1, s2, b2)

    return jnp.transpose(out_nhwc, (0, 3, 1, 2))                     # back to NCHW


# --------------------------------------------------------------------------------------
# Pure-JAX f32 reference (lax convs) for the correctness check.
# --------------------------------------------------------------------------------------
def _reference(left, bottom, params):
    hp = jax.lax.Precision.HIGHEST

    kt = jnp.flip(jnp.transpose(params["up_w"], (1, 0, 2, 3)), axis=(2, 3))  # (Cl,Cb,3,3)
    fb = jax.lax.conv_general_dilated(
        bottom, kt, window_strides=(1, 1), padding=[(2, 2), (2, 2)],
        lhs_dilation=(2, 2), dimension_numbers=("NCHW", "OIHW", "NCHW"), precision=hp)
    fb = fb + params["up_b"][None, :, None, None]
    x1 = left + fb

    def cbr(x, w, b, g, beta, mean, var):
        y = jax.lax.conv_general_dilated(
            x, w, window_strides=(1, 1), padding=[(1, 1), (1, 1)],
            dimension_numbers=("NCHW", "OIHW", "NCHW"), precision=hp)
        y = y + b[None, :, None, None]
        y = (y - mean[None, :, None, None]) / jnp.sqrt(var[None, :, None, None] + _BN_EPS)
        y = y * g[None, :, None, None] + beta[None, :, None, None]
        return jnp.maximum(y, 0.0)

    y1 = cbr(x1, params["c1_w"], params["c1_b"], params["bn1_g"], params["bn1_b"],
             params["bn1_m"], params["bn1_v"])
    y2 = cbr(y1, params["c2_w"], params["c2_b"], params["bn2_g"], params["bn2_b"],
             params["bn2_m"], params["bn2_v"])
    return y2


# --------------------------------------------------------------------------------------
def _make_params(key, bottom_channels, left_channels, right_channels):
    ks = jax.random.split(key, 12)
    f32 = jnp.float32
    return {
        # ConvTranspose2d(Cb, Cl, 3): weight (Cb, Cl, 3, 3)
        "up_w": 0.1 * jax.random.normal(ks[0], (bottom_channels, left_channels, 3, 3), f32),
        "up_b": 0.05 * jax.random.normal(ks[1], (left_channels,), f32),
        # Conv2d(Cl, Cl, 3) + BN(Cl)
        "c1_w": 0.1 * jax.random.normal(ks[2], (left_channels, left_channels, 3, 3), f32),
        "c1_b": 0.05 * jax.random.normal(ks[3], (left_channels,), f32),
        "bn1_g": 1.0 + 0.1 * jax.random.normal(ks[4], (left_channels,), f32),
        "bn1_b": 0.05 * jax.random.normal(ks[5], (left_channels,), f32),
        "bn1_m": 0.1 * jax.random.normal(ks[6], (left_channels,), f32),
        "bn1_v": 1.0 + 0.1 * jnp.abs(jax.random.normal(ks[7], (left_channels,), f32)),
        # Conv2d(Cl, Cr, 3) + BN(Cr)
        "c2_w": 0.1 * jax.random.normal(ks[8], (right_channels, left_channels, 3, 3), f32),
        "c2_b": 0.05 * jax.random.normal(ks[9], (right_channels,), f32),
        "bn2_g": 1.0 + 0.1 * jax.random.normal(ks[10], (right_channels,), f32),
        "bn2_b": 0.05 * jax.random.normal(ks[11], (right_channels,), f32),
        "bn2_m": jnp.linspace(-0.1, 0.1, right_channels, dtype=f32),
        "bn2_v": 1.0 + jnp.linspace(0.0, 0.2, right_channels, dtype=f32),
    }


if __name__ == "__main__":
    key = jax.random.PRNGKey(0)
    k_left, k_bottom, k_params = jax.random.split(key, 3)

    N = 2
    bottom_channels, left_channels, right_channels = 8, 4, 6
    h = w = 4                      # bottom spatial
    H = Wd = 2 * h + 1             # ConvTranspose2d(k=3, s=2) output spatial = 9

    bottom = jax.random.normal(k_bottom, (N, bottom_channels, h, w), jnp.float32)
    left = jax.random.normal(k_left, (N, left_channels, H, Wd), jnp.float32)
    params = _make_params(k_params, bottom_channels, left_channels, right_channels)

    out = jax.jit(unet_up2_forward)(left, bottom, params)
    out = jax.block_until_ready(out)

    ref = _reference(left, bottom, params)
    assert out.shape == ref.shape == (N, right_channels, H, Wd)

    err = float(jnp.max(jnp.abs(out - ref)))
    mean_err = float(jnp.mean(jnp.abs(out - ref)))
    # bf16 MXU operands (f32 accumulation + f32 inter-stage scratch) vs the f32 reference.
    if err < 8e-2 and mean_err < 1e-2:
        print("KERNEL_OK")
    else:
        print(f"MISMATCH max_abs_err={err} mean_abs_err={mean_err}")
</pallas_src>

<mosaic_0001>
module attributes {stable_mosaic.version = 11 : i64} {
  func.func @_unet_up2_kernel(%arg0: i32, %arg1: memref<1x11x11x8xbf16, #tpu.memory_space<vmem>>, %arg2: memref<1x9x9x4xbf16, #tpu.memory_space<vmem>>, %arg3: memref<9x8x4xbf16, #tpu.memory_space<vmem>>, %arg4: memref<9x4x4xbf16, #tpu.memory_space<vmem>>, %arg5: memref<9x4x6xbf16, #tpu.memory_space<vmem>>, %arg6: memref<1x4xf32, #tpu.memory_space<vmem>>, %arg7: memref<1x4xf32, #tpu.memory_space<vmem>>, %arg8: memref<1x4xf32, #tpu.memory_space<vmem>>, %arg9: memref<1x6xf32, #tpu.memory_space<vmem>>, %arg10: memref<1x6xf32, #tpu.memory_space<vmem>>, %arg11: memref<1x9x9x6xf32, #tpu.memory_space<vmem>>, %arg12: memref<11x11x4xf32, #tpu.memory_space<vmem>>, %arg13: memref<11x11x4xf32, #tpu.memory_space<vmem>>) attributes {dimension_semantics = [#tpu.dimension_semantics<parallel>], iteration_bounds = array<i64: 2>, scalar_prefetch = 0 : i64, scratch_operands = 2 : i64, tpu.core_type = #tpu.core_type<tc>, window_params = [{transform_indices = @transform_0, window_bounds = array<i64: 1, 11, 11, 8>}, {transform_indices = @transform_1, window_bounds = array<i64: 1, 9, 9, 4>}, {pipeline_mode = #tpu.pipeline_mode<synchronous>, transform_indices = @transform_2, window_bounds = array<i64: 9, 8, 4>}, {pipeline_mode = #tpu.pipeline_mode<synchronous>, transform_indices = @transform_3, window_bounds = array<i64: 9, 4, 4>}, {pipeline_mode = #tpu.pipeline_mode<synchronous>, transform_indices = @transform_4, window_bounds = array<i64: 9, 4, 6>}, {pipeline_mode = #tpu.pipeline_mode<synchronous>, transform_indices = @transform_5, window_bounds = array<i64: 1, 4>}, {pipeline_mode = #tpu.pipeline_mode<synchronous>, transform_indices = @transform_6, window_bounds = array<i64: 1, 4>}, {pipeline_mode = #tpu.pipeline_mode<synchronous>, transform_indices = @transform_7, window_bounds = array<i64: 1, 4>}, {pipeline_mode = #tpu.pipeline_mode<synchronous>, transform_indices = @transform_8, window_bounds = array<i64: 1, 6>}, {pipeline_mode = #tpu.pipeline_mode<synchronous>, transform_indices = @transform_9, window_bounds = array<i64: 1, 6>}, {transform_indices = @transform_10, window_bounds = array<i64: 1, 9, 9, 6>}]} {
    %cst = arith.constant 0.000000e+00 : f32
    %0 = vector.broadcast %cst : f32 to vector<11x11x4xf32>
    %c0 = arith.constant 0 : index
    %c0_0 = arith.constant 0 : index
    %c0_1 = arith.constant 0 : index
    %1 = vector.load %arg12[%c0, %c0_0, %c0_1] : memref<11x11x4xf32, #tpu.memory_space<vmem>>, vector<11x11x4xf32>
    tpu.vector_store %arg12[%c0, %c0_0, %c0_1], %0 {strides = array<i32>} : memref<11x11x4xf32, #tpu.memory_space<vmem>>, vector<11x11x4xf32>,
    %cst_2 = arith.constant 0.000000e+00 : f32
    %2 = vector.broadcast %cst_2 : f32 to vector<11x11x4xf32>
    %c0_3 = arith.constant 0 : index
    %c0_4 = arith.constant 0 : index
    %c0_5 = arith.constant 0 : index
    %3 = vector.load %arg13[%c0_3, %c0_4, %c0_5] : memref<11x11x4xf32, #tpu.memory_space<vmem>>, vector<11x11x4xf32>
    tpu.vector_store %arg13[%c0_3, %c0_4, %c0_5], %2 {strides = array<i32>} : memref<11x11x4xf32, #tpu.memory_space<vmem>>, vector<11x11x4xf32>,
    %c0_6 = arith.constant 0 : index
    %c0_7 = arith.constant 0 : index
    %c0_8 = arith.constant 0 : index
    %4 = vector.load %arg3[%c0_6, %c0_7, %c0_8] : memref<9x8x4xbf16, #tpu.memory_space<vmem>>, vector<1x8x4xbf16>
    %5 = vector.shape_cast %4 : vector<1x8x4xbf16> to vector<8x4xbf16>
    %c1 = arith.constant 1 : index
    %c0_9 = arith.constant 0 : index
    %c0_10 = arith.constant 0 : index
    %6 = vector.load %arg3[%c1, %c0_9, %c0_10] : memref<9x8x4xbf16, #tpu.memory_space<vmem>>, vector<1x8x4xbf16>
    %7 = vector.shape_cast %6 : vector<1x8x4xbf16> to vector<8x4xbf16>
    %c2 = arith.constant 2 : index
    %c0_11 = arith.constant 0 : index
    %c0_12 = arith.constant 0 : index
    %8 = vector.load %arg3[%c2, %c0_11, %c0_12] : memref<9x8x4xbf16, #tpu.memory_space<vmem>>, vector<1x8x4xbf16>
    %9 = vector.shape_cast %8 : vector<1x8x4xbf16> to vector<8x4xbf16>
    %c3 = arith.constant 3 : index
    %c0_13 = arith.constant 0 : index
    %c0_14 = arith.constant 0 : index
    %10 = vector.load %arg3[%c3, %c0_13, %c0_14] : memref<9x8x4xbf16, #tpu.memory_space<vmem>>, vector<1x8x4xbf16>
    %11 = vector.shape_cast %10 : vector<1x8x4xbf16> to vector<8x4xbf16>
    %c4 = arith.constant 4 : index
    %c0_15 = arith.constant 0 : index
    %c0_16 = arith.constant 0 : index
    %12 = vector.load %arg3[%c4, %c0_15, %c0_16] : memref<9x8x4xbf16, #tpu.memory_space<vmem>>, vector<1x8x4xbf16>
    %13 = vector.shape_cast %12 : vector<1x8x4xbf16> to vector<8x4xbf16>
    %c5 = arith.constant 5 : index
    %c0_17 = arith.constant 0 : index
    %c0_18 = arith.constant 0 : index
    %14 = vector.load %arg3[%c5, %c0_17, %c0_18] : memref<9x8x4xbf16, #tpu.memory_space<vmem>>, vector<1x8x4xbf16>
    %15 = vector.shape_cast %14 : vector<1x8x4xbf16> to vector<8x4xbf16>
    %c6 = arith.constant 6 : index
    %c0_19 = arith.constant 0 : index
    %c0_20 = arith.constant 0 : index
    %16 = vector.load %arg3[%c6, %c0_19, %c0_20] : memref<9x8x4xbf16, #tpu.memory_space<vmem>>, vector<1x8x4xbf16>
    %17 = vector.shape_cast %16 : vector<1x8x4xbf16> to vector<8x4xbf16>
    %c7 = arith.constant 7 : index
    %c0_21 = arith.constant 0 : index
    %c0_22 = arith.constant 0 : index
    %18 = vector.load %arg3[%c7, %c0_21, %c0_22] : memref<9x8x4xbf16, #tpu.memory_space<vmem>>, vector<1x8x4xbf16>
    %19 = vector.shape_cast %18 : vector<1x8x4xbf16> to vector<8x4xbf16>
    %c8 = arith.constant 8 : index
    %c0_23 = arith.constant 0 : index
    %c0_24 = arith.constant 0 : index
    %20 = vector.load %arg3[%c8, %c0_23, %c0_24] : memref<9x8x4xbf16, #tpu.memory_space<vmem>>, vector<1x8x4xbf16>
    %21 = vector.shape_cast %20 : vector<1x8x4xbf16> to vector<8x4xbf16>
    %c0_25 = arith.constant 0 : index
    %c0_26 = arith.constant 0 : index
    %c0_27 = arith.constant 0 : index
    %22 = vector.load %arg4[%c0_25, %c0_26, %c0_27] : memref<9x4x4xbf16, #tpu.memory_space<vmem>>, vector<1x4x4xbf16>
    %23 = vector.shape_cast %22 : vector<1x4x4xbf16> to vector<4x4xbf16>
    %c1_28 = arith.constant 1 : index
    %c0_29 = arith.constant 0 : index
    %c0_30 = arith.constant 0 : index
    %24 = vector.load %arg4[%c1_28, %c0_29, %c0_30] : memref<9x4x4xbf16, #tpu.memory_space<vmem>>, vector<1x4x4xbf16>
    %25 = vector.shape_cast %24 : vector<1x4x4xbf16> to vector<4x4xbf16>
    %c2_31 = arith.constant 2 : index
    %c0_32 = arith.constant 0 : index
    %c0_33 = arith.constant 0 : index
    %26 = vector.load %arg4[%c2_31, %c0_32, %c0_33] : memref<9x4x4xbf16, #tpu.memory_space<vmem>>, vector<1x4x4xbf16>
    %27 = vector.shape_cast %26 : vector<1x4x4xbf16> to vector<4x4xbf16>
    %c3_34 = arith.constant 3 : index
    %c0_35 = arith.constant 0 : index
    %c0_36 = arith.constant 0 : index
    %28 = vector.load %arg4[%c3_34, %c0_35, %c0_36] : memref<9x4x4xbf16, #tpu.memory_space<vmem>>, vector<1x4x4xbf16>
    %29 = vector.shape_cast %28 : vector<1x4x4xbf16> to vector<4x4xbf16>
    %c4_37 = arith.constant 4 : index
    %c0_38 = arith.constant 0 : index
    %c0_39 = arith.constant 0 : index
    %30 = vector.load %arg4[%c4_37, %c0_38, %c0_39] : memref<9x4x4xbf16, #tpu.memory_space<vmem>>, vector<1x4x4xbf16>
    %31 = vector.shape_cast %30 : vector<1x4x4xbf16> to vector<4x4xbf16>
    %c5_40 = arith.constant 5 : index
    %c0_41 = arith.constant 0 : index
    %c0_42 = arith.constant 0 : index
    %32 = vector.load %arg4[%c5_40, %c0_41, %c0_42] : memref<9x4x4xbf16, #tpu.memory_space<vmem>>, vector<1x4x4xbf16>
    %33 = vector.shape_cast %32 : vector<1x4x4xbf16> to vector<4x4xbf16>
    %c6_43 = arith.constant 6 : index
    %c0_44 = arith.constant 0 : index
    %c0_45 = arith.constant 0 : index
    %34 = vector.load %arg4[%c6_43, %c0_44, %c0_45] : memref<9x4x4xbf16, #tpu.memory_space<vmem>>, vector<1x4x4xbf16>
    %35 = vector.shape_cast %34 : vector<1x4x4xbf16> to vector<4x4xbf16>
    %c7_46 = arith.constant 7 : index
    %c0_47 = arith.constant 0 : index
    %c0_48 = arith.constant 0 : index
    %36 = vector.load %arg4[%c7_46, %c0_47, %c0_48] : memref<9x4x4xbf16, #tpu.memory_space<vmem>>, vector<1x4x4xbf16>
    %37 = vector.shape_cast %36 : vector<1x4x4xbf16> to vector<4x4xbf16>
    %c8_49 = arith.constant 8 : index
    %c0_50 = arith.constant 0 : index
    %c0_51 = arith.constant 0 : index
    %38 = vector.load %arg4[%c8_49, %c0_50, %c0_51] : memref<9x4x4xbf16, #tpu.memory_space<vmem>>, vector<1x4x4xbf16>
    %39 = vector.shape_cast %38 : vector<1x4x4xbf16> to vector<4x4xbf16>
    %c0_52 = arith.constant 0 : index
    %c0_53 = arith.constant 0 : index
    %c0_54 = arith.constant 0 : index
    %40 = vector.load %arg5[%c0_52, %c0_53, %c0_54] : memref<9x4x6xbf16, #tpu.memory_space<vmem>>, vector<1x4x6xbf16>
    %41 = vector.shape_cast %40 : vector<1x4x6xbf16> to vector<4x6xbf16>
    %c1_55 = arith.constant 1 : index
    %c0_56 = arith.constant 0 : index
    %c0_57 = arith.constant 0 : index
    %42 = vector.load %arg5[%c1_55, %c0_56, %c0_57] : memref<9x4x6xbf16, #tpu.memory_space<vmem>>, vector<1x4x6xbf16>
    %43 = vector.shape_cast %42 : vector<1x4x6xbf16> to vector<4x6xbf16>
    %c2_58 = arith.constant 2 : index
    %c0_59 = arith.constant 0 : index
    %c0_60 = arith.constant 0 : index
    %44 = vector.load %arg5[%c2_58, %c0_59, %c0_60] : memref<9x4x6xbf16, #tpu.memory_space<vmem>>, vector<1x4x6xbf16>
    %45 = vector.shape_cast %44 : vector<1x4x6xbf16> to vector<4x6xbf16>
    %c3_61 = arith.constant 3 : index
    %c0_62 = arith.constant 0 : index
    %c0_63 = arith.constant 0 : index
    %46 = vector.load %arg5[%c3_61, %c0_62, %c0_63] : memref<9x4x6xbf16, #tpu.memory_space<vmem>>, vector<1x4x6xbf16>
    %47 = vector.shape_cast %46 : vector<1x4x6xbf16> to vector<4x6xbf16>
    %c4_64 = arith.constant 4 : index
    %c0_65 = arith.constant 0 : index
    %c0_66 = arith.constant 0 : index
    %48 = vector.load %arg5[%c4_64, %c0_65, %c0_66] : memref<9x4x6xbf16, #tpu.memory_space<vmem>>, vector<1x4x6xbf16>
    %49 = vector.shape_cast %48 : vector<1x4x6xbf16> to vector<4x6xbf16>
    %c5_67 = arith.constant 5 : index
    %c0_68 = arith.constant 0 : index
    %c0_69 = arith.constant 0 : index
    %50 = vector.load %arg5[%c5_67, %c0_68, %c0_69] : memref<9x4x6xbf16, #tpu.memory_space<vmem>>, vector<1x4x6xbf16>
    %51 = vector.shape_cast %50 : vector<1x4x6xbf16> to vector<4x6xbf16>
    %c6_70 = arith.constant 6 : index
    %c0_71 = arith.constant 0 : index
    %c0_72 = arith.constant 0 : index
    %52 = vector.load %arg5[%c6_70, %c0_71, %c0_72] : memref<9x4x6xbf16, #tpu.memory_space<vmem>>, vector<1x4x6xbf16>
    %53 = vector.shape_cast %52 : vector<1x4x6xbf16> to vector<4x6xbf16>
    %c7_73 = arith.constant 7 : index
    %c0_74 = arith.constant 0 : index
    %c0_75 = arith.constant 0 : index
    %54 = vector.load %arg5[%c7_73, %c0_74, %c0_75] : memref<9x4x6xbf16, #tpu.memory_space<vmem>>, vector<1x4x6xbf16>
    %55 = vector.shape_cast %54 : vector<1x4x6xbf16> to vector<4x6xbf16>
    %c8_76 = arith.constant 8 : index
    %c0_77 = arith.constant 0 : index
    %c0_78 = arith.constant 0 : index
    %56 = vector.load %arg5[%c8_76, %c0_77, %c0_78] : memref<9x4x6xbf16, #tpu.memory_space<vmem>>, vector<1x4x6xbf16>
    %57 = vector.shape_cast %56 : vector<1x4x6xbf16> to vector<4x6xbf16>
    %c0_79 = arith.constant 0 : index
    %c0_80 = arith.constant 0 : index
    %58 = vector.load %arg6[%c0_79, %c0_80] : memref<1x4xf32, #tpu.memory_space<vmem>>, vector<1x4xf32>
    %c0_81 = arith.constant 0 : index
    %c0_82 = arith.constant 0 : index
    %59 = vector.load %arg7[%c0_81, %c0_82] : memref<1x4xf32, #tpu.memory_space<vmem>>, vector<1x4xf32>
    %c0_83 = arith.constant 0 : index
    %c0_84 = arith.constant 0 : index
    %60 = vector.load %arg8[%c0_83, %c0_84] : memref<1x4xf32, #tpu.memory_space<vmem>>, vector<1x4xf32>
    %c0_85 = arith.constant 0 : index
    %c0_86 = arith.constant 0 : index
    %61 = vector.load %arg9[%c0_85, %c0_86] : memref<1x6xf32, #tpu.memory_space<vmem>>, vector<1x6xf32>
    %c0_87 = arith.constant 0 : index
    %c0_88 = arith.constant 0 : index
    %62 = vector.load %arg10[%c0_87, %c0_88] : memref<1x6xf32, #tpu.memory_space<vmem>>, vector<1x6xf32>
    %c0_i32 = arith.constant 0 : i32
    %c9_i32 = arith.constant 9 : i32
    %63 = arith.addi %c0_i32, %c9_i32 : i32
    %c1_i32 = arith.constant 1 : i32
    scf.for %arg14 = %c0_i32 to %63 step %c1_i32  : i32 {
      %cst_98 = arith.constant 0.000000e+00 : f32
      %66 = vector.broadcast %cst_98 : f32 to vector<9x4xf32>
      %c0_i32_99 = arith.constant 0 : i32
      %67 = arith.addi %arg14, %c0_i32_99 : i32
      %c0_100 = arith.constant 0 : index
      %68 = arith.index_cast %67 : i32 to index
      %c0_101 = arith.constant 0 : index
      %c0_102 = arith.constant 0 : index
      %69 = vector.load %arg1[%c0_100, %68, %c0_101, %c0_102] : memref<1x11x11x8xbf16, #tpu.memory_space<vmem>>, vector<1x1x9x8xbf16>
      %70 = vector.shape_cast %69 : vector<1x1x9x8xbf16> to vector<9x8xbf16>
      %cst_103 = arith.constant dense<0.000000e+00> : vector<9x4xf32>
      %71 = tpu.matmul %70, %5, %cst_103 {dimension_numbers = #tpu.dot_dimension_numbers<[1], [0], [0], [1], [0, 0, 1, 1], [], []>} : vector<9x8xbf16>, vector<8x4xbf16>, vector<9x4xf32> -> vector<9x4xf32>
      %72 = arith.addf %66, %71 : vector<9x4xf32>
      %c0_i32_104 = arith.constant 0 : i32
      %73 = arith.addi %arg14, %c0_i32_104 : i32
      %c0_105 = arith.constant 0 : index
      %74 = arith.index_cast %73 : i32 to index
      %c1_106 = arith.constant 1 : index
      %c0_107 = arith.constant 0 : index
      %75 = vector.load %arg1[%c0_105, %74, %c1_106, %c0_107] : memref<1x11x11x8xbf16, #tpu.memory_space<vmem>>, vector<1x1x9x8xbf16>
      %76 = vector.shape_cast %75 : vector<1x1x9x8xbf16> to vector<9x8xbf16>
      %cst_108 = arith.constant dense<0.000000e+00> : vector<9x4xf32>
      %77 = tpu.matmul %76, %7, %cst_108 {dimension_numbers = #tpu.dot_dimension_numbers<[1], [0], [0], [1], [0, 0, 1, 1], [], []>} : vector<9x8xbf16>, vector<8x4xbf16>, vector<9x4xf32> -> vector<9x4xf32>
      %78 = arith.addf %72, %77 : vector<9x4xf32>
      %c0_i32_109 = arith.constant 0 : i32
      %79 = arith.addi %arg14, %c0_i32_109 : i32
      %c0_110 = arith.constant 0 : index
      %80 = arith.index_cast %79 : i32 to index
      %c2_111 = arith.constant 2 : index
      %c0_112 = arith.constant 0 : index
      %81 = vector.load %arg1[%c0_110, %80, %c2_111, %c0_112] : memref<1x11x11x8xbf16, #tpu.memory_space<vmem>>, vector<1x1x9x8xbf16>
      %82 = vector.shape_cast %81 : vector<1x1x9x8xbf16> to vector<9x8xbf16>
      %cst_113 = arith.constant dense<0.000000e+00> : vector<9x4xf32>
      %83 = tpu.matmul %82, %9, %cst_113 {dimension_numbers = #tpu.dot_dimension_numbers<[1], [0], [0], [1], [0, 0, 1, 1], [], []>} : vector<9x8xbf16>, vector<8x4xbf16>, vector<9x4xf32> -> vector<9x4xf32>
      %84 = arith.addf %78, %83 : vector<9x4xf32>
      %c1_i32_114 = arith.constant 1 : i32
      %85 = arith.addi %arg14, %c1_i32_114 : i32
      %c0_115 = arith.constant 0 : index
      %86 = arith.index_cast %85 : i32 to index
      %c0_116 = arith.constant 0 : index
      %c0_117 = arith.constant 0 : index
      %87 = vector.load %arg1[%c0_115, %86, %c0_116, %c0_117] : memref<1x11x11x8xbf16, #tpu.memory_space<vmem>>, vector<1x1x9x8xbf16>
      %88 = vector.shape_cast %87 : vector<1x1x9x8xbf16> to vector<9x8xbf16>
      %cst_118 = arith.constant dense<0.000000e+00> : vector<9x4xf32>
      %89 = tpu.matmul %88, %11, %cst_118 {dimension_numbers = #tpu.dot_dimension_numbers<[1], [0], [0], [1], [0, 0, 1, 1], [], []>} : vector<9x8xbf16>, vector<8x4xbf16>, vector<9x4xf32> -> vector<9x4xf32>
      %90 = arith.addf %84, %89 : vector<9x4xf32>
      %c1_i32_119 = arith.constant 1 : i32
      %91 = arith.addi %arg14, %c1_i32_119 : i32
      %c0_120 = arith.constant 0 : index
      %92 = arith.index_cast %91 : i32 to index
      %c1_121 = arith.constant 1 : index
      %c0_122 = arith.constant 0 : index
      %93 = vector.load %arg1[%c0_120, %92, %c1_121, %c0_122] : memref<1x11x11x8xbf16, #tpu.memory_space<vmem>>, vector<1x1x9x8xbf16>
      %94 = vector.shape_cast %93 : vector<1x1x9x8xbf16> to vector<9x8xbf16>
      %cst_123 = arith.constant dense<0.000000e+00> : vector<9x4xf32>
      %95 = tpu.matmul %94, %13, %cst_123 {dimension_numbers = #tpu.dot_dimension_numbers<[1], [0], [0], [1], [0, 0, 1, 1], [], []>} : vector<9x8xbf16>, vector<8x4xbf16>, vector<9x4xf32> -> vector<9x4xf32>
      %96 = arith.addf %90, %95 : vector<9x4xf32>
      %c1_i32_124 = arith.constant 1 : i32
      %97 = arith.addi %arg14, %c1_i32_124 : i32
      %c0_125 = arith.constant 0 : index
      %98 = arith.index_cast %97 : i32 to index
      %c2_126 = arith.constant 2 : index
      %c0_127 = arith.constant 0 : index
      %99 = vector.load %arg1[%c0_125, %98, %c2_126, %c0_127] : memref<1x11x11x8xbf16, #tpu.memory_space<vmem>>, vector<1x1x9x8xbf16>
      %100 = vector.shape_cast %99 : vector<1x1x9x8xbf16> to vector<9x8xbf16>
      %cst_128 = arith.constant dense<0.000000e+00> : vector<9x4xf32>
      %101 = tpu.matmul %100, %15, %cst_128 {dimension_numbers = #tpu.dot_dimension_numbers<[1], [0], [0], [1], [0, 0, 1, 1], [], []>} : vector<9x8xbf16>, vector<8x4xbf16>, vector<9x4xf32> -> vector<9x4xf32>
      %102 = arith.addf %96, %101 : vector<9x4xf32>
      %c2_i32 = arith.constant 2 : i32
      %103 = arith.addi %arg14, %c2_i32 : i32
      %c0_129 = arith.constant 0 : index
      %104 = arith.index_cast %103 : i32 to index
      %c0_130 = arith.constant 0 : index
      %c0_131 = arith.constant 0 : index
      %105 = vector.load %arg1[%c0_129, %104, %c0_130, %c0_131] : memref<1x11x11x8xbf16, #tpu.memory_space<vmem>>, vector<1x1x9x8xbf16>
      %106 = vector.shape_cast %105 : vector<1x1x9x8xbf16> to vector<9x8xbf16>
      %cst_132 = arith.constant dense<0.000000e+00> : vector<9x4xf32>
      %107 = tpu.matmul %106, %17, %cst_132 {dimension_numbers = #tpu.dot_dimension_numbers<[1], [0], [0], [1], [0, 0, 1, 1], [], []>} : vector<9x8xbf16>, vector<8x4xbf16>, vector<9x4xf32> -> vector<9x4xf32>
      %108 = arith.addf %102, %107 : vector<9x4xf32>
      %c2_i32_133 = arith.constant 2 : i32
      %109 = arith.addi %arg14, %c2_i32_133 : i32
      %c0_134 = arith.constant 0 : index
      %110 = arith.index_cast %109 : i32 to index
      %c1_135 = arith.constant 1 : index
      %c0_136 = arith.constant 0 : index
      %111 = vector.load %arg1[%c0_134, %110, %c1_135, %c0_136] : memref<1x11x11x8xbf16, #tpu.memory_space<vmem>>, vector<1x1x9x8xbf16>
      %112 = vector.shape_cast %111 : vector<1x1x9x8xbf16> to vector<9x8xbf16>
      %cst_137 = arith.constant dense<0.000000e+00> : vector<9x4xf32>
      %113 = tpu.matmul %112, %19, %cst_137 {dimension_numbers = #tpu.dot_dimension_numbers<[1], [0], [0], [1], [0, 0, 1, 1], [], []>} : vector<9x8xbf16>, vector<8x4xbf16>, vector<9x4xf32> -> vector<9x4xf32>
      %114 = arith.addf %108, %113 : vector<9x4xf32>
      %c2_i32_138 = arith.constant 2 : i32
      %115 = arith.addi %arg14, %c2_i32_138 : i32
      %c0_139 = arith.constant 0 : index
      %116 = arith.index_cast %115 : i32 to index
      %c2_140 = arith.constant 2 : index
      %c0_141 = arith.constant 0 : index
      %117 = vector.load %arg1[%c0_139, %116, %c2_140, %c0_141] : memref<1x11x11x8xbf16, #tpu.memory_space<vmem>>, vector<1x1x9x8xbf16>
      %118 = vector.shape_cast %117 : vector<1x1x9x8xbf16> to vector<9x8xbf16>
      %cst_142 = arith.constant dense<0.000000e+00> : vector<9x4xf32>
      %119 = tpu.matmul %118, %21, %cst_142 {dimension_numbers = #tpu.dot_dimension_numbers<[1], [0], [0], [1], [0, 0, 1, 1], [], []>} : vector<9x8xbf16>, vector<8x4xbf16>, vector<9x4xf32> -> vector<9x4xf32>
      %120 = arith.addf %114, %119 : vector<9x4xf32>
      %121 = vector.broadcast %58 : vector<1x4xf32> to vector<9x4xf32>
      %122 = arith.addf %120, %121 : vector<9x4xf32>
      %c0_143 = arith.constant 0 : index
      %123 = arith.index_cast %arg14 : i32 to index
      %c0_144 = arith.constant 0 : index
      %c0_145 = arith.constant 0 : index
      %124 = vector.load %arg2[%c0_143, %123, %c0_144, %c0_145] : memref<1x9x9x4xbf16, #tpu.memory_space<vmem>>, vector<1x1x9x4xbf16>
      %125 = vector.shape_cast %124 : vector<1x1x9x4xbf16> to vector<9x4xbf16>
      %126 = arith.extf %125 : vector<9x4xbf16> to vector<9x4xf32>
      %127 = arith.addf %122, %126 : vector<9x4xf32>
      %c1_i32_146 = arith.constant 1 : i32
      %128 = arith.addi %arg14, %c1_i32_146 : i32
      %129 = arith.index_cast %128 : i32 to index
      %c1_147 = arith.constant 1 : index
      %c0_148 = arith.constant 0 : index
      %130 = vector.load %arg12[%129, %c1_147, %c0_148] : memref<11x11x4xf32, #tpu.memory_space<vmem>>, vector<1x9x4xf32>
      %131 = vector.shape_cast %130 : vector<1x9x4xf32> to vector<9x4xf32>
      %132 = vector.shape_cast %127 : vector<9x4xf32> to vector<1x9x4xf32>
      tpu.vector_store %arg12[%129, %c1_147, %c0_148], %132 {strides = array<i32>} : memref<11x11x4xf32, #tpu.memory_space<vmem>>, vector<1x9x4xf32>,
    }
    %c9_i32_89 = arith.constant 9 : i32
    %c0_i32_90 = arith.constant 0 : i32
    %c9_i32_91 = arith.constant 9 : i32
    %64 = arith.addi %c0_i32_90, %c9_i32_91 : i32
    %c1_i32_92 = arith.constant 1 : i32
    scf.for %arg14 = %c0_i32_90 to %64 step %c1_i32_92  : i32 {
      %cst_98 = arith.constant 0.000000e+00 : f32
      %66 = vector.broadcast %cst_98 : f32 to vector<9x4xf32>
      %c0_i32_99 = arith.constant 0 : i32
      %67 = arith.addi %arg14, %c0_i32_99 : i32
      %68 = arith.index_cast %67 : i32 to index
      %c0_100 = arith.constant 0 : index
      %c0_101 = arith.constant 0 : index
      %69 = vector.load %arg12[%68, %c0_100, %c0_101] : memref<11x11x4xf32, #tpu.memory_space<vmem>>, vector<1x9x4xf32>
      %70 = vector.shape_cast %69 : vector<1x9x4xf32> to vector<9x4xf32>
      %71 = arith.truncf %70 : vector<9x4xf32> to vector<9x4xbf16>
      %cst_102 = arith.constant dense<0.000000e+00> : vector<9x4xf32>
      %72 = tpu.matmul %71, %23, %cst_102 {dimension_numbers = #tpu.dot_dimension_numbers<[1], [0], [0], [1], [0, 0, 1, 1], [], []>} : vector<9x4xbf16>, vector<4x4xbf16>, vector<9x4xf32> -> vector<9x4xf32>
      %73 = arith.addf %66, %72 : vector<9x4xf32>
      %c0_i32_103 = arith.constant 0 : i32
      %74 = arith.addi %arg14, %c0_i32_103 : i32
      %75 = arith.index_cast %74 : i32 to index
      %c1_104 = arith.constant 1 : index
      %c0_105 = arith.constant 0 : index
      %76 = vector.load %arg12[%75, %c1_104, %c0_105] : memref<11x11x4xf32, #tpu.memory_space<vmem>>, vector<1x9x4xf32>
      %77 = vector.shape_cast %76 : vector<1x9x4xf32> to vector<9x4xf32>
      %78 = arith.truncf %77 : vector<9x4xf32> to vector<9x4xbf16>
      %cst_106 = arith.constant dense<0.000000e+00> : vector<9x4xf32>
      %79 = tpu.matmul %78, %25, %cst_106 {dimension_numbers = #tpu.dot_dimension_numbers<[1], [0], [0], [1], [0, 0, 1, 1], [], []>} : vector<9x4xbf16>, vector<4x4xbf16>, vector<9x4xf32> -> vector<9x4xf32>
      %80 = arith.addf %73, %79 : vector<9x4xf32>
      %c0_i32_107 = arith.constant 0 : i32
      %81 = arith.addi %arg14, %c0_i32_107 : i32
      %82 = arith.index_cast %81 : i32 to index
      %c2_108 = arith.constant 2 : index
      %c0_109 = arith.constant 0 : index
      %83 = vector.load %arg12[%82, %c2_108, %c0_109] : memref<11x11x4xf32, #tpu.memory_space<vmem>>, vector<1x9x4xf32>
      %84 = vector.shape_cast %83 : vector<1x9x4xf32> to vector<9x4xf32>
      %85 = arith.truncf %84 : vector<9x4xf32> to vector<9x4xbf16>
      %cst_110 = arith.constant dense<0.000000e+00> : vector<9x4xf32>
      %86 = tpu.matmul %85, %27, %cst_110 {dimension_numbers = #tpu.dot_dimension_numbers<[1], [0], [0], [1], [0, 0, 1, 1], [], []>} : vector<9x4xbf16>, vector<4x4xbf16>, vector<9x4xf32> -> vector<9x4xf32>
      %87 = arith.addf %80, %86 : vector<9x4xf32>
      %c1_i32_111 = arith.constant 1 : i32
      %88 = arith.addi %arg14, %c1_i32_111 : i32
      %89 = arith.index_cast %88 : i32 to index
      %c0_112 = arith.constant 0 : index
      %c0_113 = arith.constant 0 : index
      %90 = vector.load %arg12[%89, %c0_112, %c0_113] : memref<11x11x4xf32, #tpu.memory_space<vmem>>, vector<1x9x4xf32>
      %91 = vector.shape_cast %90 : vector<1x9x4xf32> to vector<9x4xf32>
      %92 = arith.truncf %91 : vector<9x4xf32> to vector<9x4xbf16>
      %cst_114 = arith.constant dense<0.000000e+00> : vector<9x4xf32>
      %93 = tpu.matmul %92, %29, %cst_114 {dimension_numbers = #tpu.dot_dimension_numbers<[1], [0], [0], [1], [0, 0, 1, 1], [], []>} : vector<9x4xbf16>, vector<4x4xbf16>, vector<9x4xf32> -> vector<9x4xf32>
      %94 = arith.addf %87, %93 : vector<9x4xf32>
      %c1_i32_115 = arith.constant 1 : i32
      %95 = arith.addi %arg14, %c1_i32_115 : i32
      %96 = arith.index_cast %95 : i32 to index
      %c1_116 = arith.constant 1 : index
      %c0_117 = arith.constant 0 : index
      %97 = vector.load %arg12[%96, %c1_116, %c0_117] : memref<11x11x4xf32, #tpu.memory_space<vmem>>, vector<1x9x4xf32>
      %98 = vector.shape_cast %97 : vector<1x9x4xf32> to vector<9x4xf32>
      %99 = arith.truncf %98 : vector<9x4xf32> to vector<9x4xbf16>
      %cst_118 = arith.constant dense<0.000000e+00> : vector<9x4xf32>
      %100 = tpu.matmul %99, %31, %cst_118 {dimension_numbers = #tpu.dot_dimension_numbers<[1], [0], [0], [1], [0, 0, 1, 1], [], []>} : vector<9x4xbf16>, vector<4x4xbf16>, vector<9x4xf32> -> vector<9x4xf32>
      %101 = arith.addf %94, %100 : vector<9x4xf32>
      %c1_i32_119 = arith.constant 1 : i32
      %102 = arith.addi %arg14, %c1_i32_119 : i32
      %103 = arith.index_cast %102 : i32 to index
      %c2_120 = arith.constant 2 : index
      %c0_121 = arith.constant 0 : index
      %104 = vector.load %arg12[%103, %c2_120, %c0_121] : memref<11x11x4xf32, #tpu.memory_space<vmem>>, vector<1x9x4xf32>
      %105 = vector.shape_cast %104 : vector<1x9x4xf32> to vector<9x4xf32>
      %106 = arith.truncf %105 : vector<9x4xf32> to vector<9x4xbf16>
      %cst_122 = arith.constant dense<0.000000e+00> : vector<9x4xf32>
      %107 = tpu.matmul %106, %33, %cst_122 {dimension_numbers = #tpu.dot_dimension_numbers<[1], [0], [0], [1], [0, 0, 1, 1], [], []>} : vector<9x4xbf16>, vector<4x4xbf16>, vector<9x4xf32> -> vector<9x4xf32>
      %108 = arith.addf %101, %107 : vector<9x4xf32>
      %c2_i32 = arith.constant 2 : i32
      %109 = arith.addi %arg14, %c2_i32 : i32
      %110 = arith.index_cast %109 : i32 to index
      %c0_123 = arith.constant 0 : index
      %c0_124 = arith.constant 0 : index
      %111 = vector.load %arg12[%110, %c0_123, %c0_124] : memref<11x11x4xf32, #tpu.memory_space<vmem>>, vector<1x9x4xf32>
      %112 = vector.shape_cast %111 : vector<1x9x4xf32> to vector<9x4xf32>
      %113 = arith.truncf %112 : vector<9x4xf32> to vector<9x4xbf16>
      %cst_125 = arith.constant dense<0.000000e+00> : vector<9x4xf32>
      %114 = tpu.matmul %113, %35, %cst_125 {dimension_numbers = #tpu.dot_dimension_numbers<[1], [0], [0], [1], [0, 0, 1, 1], [], []>} : vector<9x4xbf16>, vector<4x4xbf16>, vector<9x4xf32> -> vector<9x4xf32>
      %115 = arith.addf %108, %114 : vector<9x4xf32>
      %c2_i32_126 = arith.constant 2 : i32
      %116 = arith.addi %arg14, %c2_i32_126 : i32
      %117 = arith.index_cast %116 : i32 to index
      %c1_127 = arith.constant 1 : index
      %c0_128 = arith.constant 0 : index
      %118 = vector.load %arg12[%117, %c1_127, %c0_128] : memref<11x11x4xf32, #tpu.memory_space<vmem>>, vector<1x9x4xf32>
      %119 = vector.shape_cast %118 : vector<1x9x4xf32> to vector<9x4xf32>
      %120 = arith.truncf %119 : vector<9x4xf32> to vector<9x4xbf16>
      %cst_129 = arith.constant dense<0.000000e+00> : vector<9x4xf32>
      %121 = tpu.matmul %120, %37, %cst_129 {dimension_numbers = #tpu.dot_dimension_numbers<[1], [0], [0], [1], [0, 0, 1, 1], [], []>} : vector<9x4xbf16>, vector<4x4xbf16>, vector<9x4xf32> -> vector<9x4xf32>
      %122 = arith.addf %115, %121 : vector<9x4xf32>
      %c2_i32_130 = arith.constant 2 : i32
      %123 = arith.addi %arg14, %c2_i32_130 : i32
      %124 = arith.index_cast %123 : i32 to index
      %c2_131 = arith.constant 2 : index
      %c0_132 = arith.constant 0 : index
      %125 = vector.load %arg12[%124, %c2_131, %c0_132] : memref<11x11x4xf32, #tpu.memory_space<vmem>>, vector<1x9x4xf32>
      %126 = vector.shape_cast %125 : vector<1x9x4xf32> to vector<9x4xf32>
      %127 = arith.truncf %126 : vector<9x4xf32> to vector<9x4xbf16>
      %cst_133 = arith.constant dense<0.000000e+00> : vector<9x4xf32>
      %128 = tpu.matmul %127, %39, %cst_133 {dimension_numbers = #tpu.dot_dimension_numbers<[1], [0], [0], [1], [0, 0, 1, 1], [], []>} : vector<9x4xbf16>, vector<4x4xbf16>, vector<9x4xf32> -> vector<9x4xf32>
      %129 = arith.addf %122, %128 : vector<9x4xf32>
      %130 = vector.broadcast %59 : vector<1x4xf32> to vector<9x4xf32>
      %131 = arith.mulf %129, %130 : vector<9x4xf32>
      %132 = vector.broadcast %60 : vector<1x4xf32> to vector<9x4xf32>
      %133 = arith.addf %131, %132 : vector<9x4xf32>
      %cst_134 = arith.constant 0.000000e+00 : f32
      %134 = vector.broadcast %cst_134 : f32 to vector<9x4xf32>
      %135 = arith.maximumf %133, %134 : vector<9x4xf32>
      %c1_i32_135 = arith.constant 1 : i32
      %136 = arith.addi %arg14, %c1_i32_135 : i32
      %137 = arith.index_cast %136 : i32 to index
      %c1_136 = arith.constant 1 : index
      %c0_137 = arith.constant 0 : index
      %138 = vector.load %arg13[%137, %c1_136, %c0_137] : memref<11x11x4xf32, #tpu.memory_space<vmem>>, vector<1x9x4xf32>
      %139 = vector.shape_cast %138 : vector<1x9x4xf32> to vector<9x4xf32>
      %140 = vector.shape_cast %135 : vector<9x4xf32> to vector<1x9x4xf32>
      tpu.vector_store %arg13[%137, %c1_136, %c0_137], %140 {strides = array<i32>} : memref<11x11x4xf32, #tpu.memory_space<vmem>>, vector<1x9x4xf32>,
    }
    %c9_i32_93 = arith.constant 9 : i32
    %c0_i32_94 = arith.constant 0 : i32
    %c9_i32_95 = arith.constant 9 : i32
    %65 = arith.addi %c0_i32_94, %c9_i32_95 : i32
    %c1_i32_96 = arith.constant 1 : i32
    scf.for %arg14 = %c0_i32_94 to %65 step %c1_i32_96  : i32 {
      %cst_98 = arith.constant 0.000000e+00 : f32
      %66 = vector.broadcast %cst_98 : f32 to vector<9x6xf32>
      %c0_i32_99 = arith.constant 0 : i32
      %67 = arith.addi %arg14, %c0_i32_99 : i32
      %68 = arith.index_cast %67 : i32 to index
      %c0_100 = arith.constant 0 : index
      %c0_101 = arith.constant 0 : index
      %69 = vector.load %arg13[%68, %c0_100, %c0_101] : memref<11x11x4xf32, #tpu.memory_space<vmem>>, vector<1x9x4xf32>
      %70 = vector.shape_cast %69 : vector<1x9x4xf32> to vector<9x4xf32>
      %71 = arith.truncf %70 : vector<9x4xf32> to vector<9x4xbf16>
      %cst_102 = arith.constant dense<0.000000e+00> : vector<9x6xf32>
      %72 = tpu.matmul %71, %41, %cst_102 {dimension_numbers = #tpu.dot_dimension_numbers<[1], [0], [0], [1], [0, 0, 1, 1], [], []>} : vector<9x4xbf16>, vector<4x6xbf16>, vector<9x6xf32> -> vector<9x6xf32>
      %73 = arith.addf %66, %72 : vector<9x6xf32>
      %c0_i32_103 = arith.constant 0 : i32
      %74 = arith.addi %arg14, %c0_i32_103 : i32
      %75 = arith.index_cast %74 : i32 to index
      %c1_104 = arith.constant 1 : index
      %c0_105 = arith.constant 0 : index
      %76 = vector.load %arg13[%75, %c1_104, %c0_105] : memref<11x11x4xf32, #tpu.memory_space<vmem>>, vector<1x9x4xf32>
      %77 = vector.shape_cast %76 : vector<1x9x4xf32> to vector<9x4xf32>
      %78 = arith.truncf %77 : vector<9x4xf32> to vector<9x4xbf16>
      %cst_106 = arith.constant dense<0.000000e+00> : vector<9x6xf32>
      %79 = tpu.matmul %78, %43, %cst_106 {dimension_numbers = #tpu.dot_dimension_numbers<[1], [0], [0], [1], [0, 0, 1, 1], [], []>} : vector<9x4xbf16>, vector<4x6xbf16>, vector<9x6xf32> -> vector<9x6xf32>
      %80 = arith.addf %73, %79 : vector<9x6xf32>
      %c0_i32_107 = arith.constant 0 : i32
      %81 = arith.addi %arg14, %c0_i32_107 : i32
      %82 = arith.index_cast %81 : i32 to index
      %c2_108 = arith.constant 2 : index
      %c0_109 = arith.constant 0 : index
      %83 = vector.load %arg13[%82, %c2_108, %c0_109] : memref<11x11x4xf32, #tpu.memory_space<vmem>>, vector<1x9x4xf32>
      %84 = vector.shape_cast %83 : vector<1x9x4xf32> to vector<9x4xf32>
      %85 = arith.truncf %84 : vector<9x4xf32> to vector<9x4xbf16>
      %cst_110 = arith.constant dense<0.000000e+00> : vector<9x6xf32>
      %86 = tpu.matmul %85, %45, %cst_110 {dimension_numbers = #tpu.dot_dimension_numbers<[1], [0], [0], [1], [0, 0, 1, 1], [], []>} : vector<9x4xbf16>, vector<4x6xbf16>, vector<9x6xf32> -> vector<9x6xf32>
      %87 = arith.addf %80, %86 : vector<9x6xf32>
      %c1_i32_111 = arith.constant 1 : i32
      %88 = arith.addi %arg14, %c1_i32_111 : i32
      %89 = arith.index_cast %88 : i32 to index
      %c0_112 = arith.constant 0 : index
      %c0_113 = arith.constant 0 : index
      %90 = vector.load %arg13[%89, %c0_112, %c0_113] : memref<11x11x4xf32, #tpu.memory_space<vmem>>, vector<1x9x4xf32>
      %91 = vector.shape_cast %90 : vector<1x9x4xf32> to vector<9x4xf32>
      %92 = arith.truncf %91 : vector<9x4xf32> to vector<9x4xbf16>
      %cst_114 = arith.constant dense<0.000000e+00> : vector<9x6xf32>
      %93 = tpu.matmul %92, %47, %cst_114 {dimension_numbers = #tpu.dot_dimension_numbers<[1], [0], [0], [1], [0, 0, 1, 1], [], []>} : vector<9x4xbf16>, vector<4x6xbf16>, vector<9x6xf32> -> vector<9x6xf32>
      %94 = arith.addf %87, %93 : vector<9x6xf32>
      %c1_i32_115 = arith.constant 1 : i32
      %95 = arith.addi %arg14, %c1_i32_115 : i32
      %96 = arith.index_cast %95 : i32 to index
      %c1_116 = arith.constant 1 : index
      %c0_117 = arith.constant 0 : index
      %97 = vector.load %arg13[%96, %c1_116, %c0_117] : memref<11x11x4xf32, #tpu.memory_space<vmem>>, vector<1x9x4xf32>
      %98 = vector.shape_cast %97 : vector<1x9x4xf32> to vector<9x4xf32>
      %99 = arith.truncf %98 : vector<9x4xf32> to vector<9x4xbf16>
      %cst_118 = arith.constant dense<0.000000e+00> : vector<9x6xf32>
      %100 = tpu.matmul %99, %49, %cst_118 {dimension_numbers = #tpu.dot_dimension_numbers<[1], [0], [0], [1], [0, 0, 1, 1], [], []>} : vector<9x4xbf16>, vector<4x6xbf16>, vector<9x6xf32> -> vector<9x6xf32>
      %101 = arith.addf %94, %100 : vector<9x6xf32>
      %c1_i32_119 = arith.constant 1 : i32
      %102 = arith.addi %arg14, %c1_i32_119 : i32
      %103 = arith.index_cast %102 : i32 to index
      %c2_120 = arith.constant 2 : index
      %c0_121 = arith.constant 0 : index
      %104 = vector.load %arg13[%103, %c2_120, %c0_121] : memref<11x11x4xf32, #tpu.memory_space<vmem>>, vector<1x9x4xf32>
      %105 = vector.shape_cast %104 : vector<1x9x4xf32> to vector<9x4xf32>
      %106 = arith.truncf %105 : vector<9x4xf32> to vector<9x4xbf16>
      %cst_122 = arith.constant dense<0.000000e+00> : vector<9x6xf32>
      %107 = tpu.matmul %106, %51, %cst_122 {dimension_numbers = #tpu.dot_dimension_numbers<[1], [0], [0], [1], [0, 0, 1, 1], [], []>} : vector<9x4xbf16>, vector<4x6xbf16>, vector<9x6xf32> -> vector<9x6xf32>
      %108 = arith.addf %101, %107 : vector<9x6xf32>
      %c2_i32 = arith.constant 2 : i32
      %109 = arith.addi %arg14, %c2_i32 : i32
      %110 = arith.index_cast %109 : i32 to index
      %c0_123 = arith.constant 0 : index
      %c0_124 = arith.constant 0 : index
      %111 = vector.load %arg13[%110, %c0_123, %c0_124] : memref<11x11x4xf32, #tpu.memory_space<vmem>>, vector<1x9x4xf32>
      %112 = vector.shape_cast %111 : vector<1x9x4xf32> to vector<9x4xf32>
      %113 = arith.truncf %112 : vector<9x4xf32> to vector<9x4xbf16>
      %cst_125 = arith.constant dense<0.000000e+00> : vector<9x6xf32>
      %114 = tpu.matmul %113, %53, %cst_125 {dimension_numbers = #tpu.dot_dimension_numbers<[1], [0], [0], [1], [0, 0, 1, 1], [], []>} : vector<9x4xbf16>, vector<4x6xbf16>, vector<9x6xf32> -> vector<9x6xf32>
      %115 = arith.addf %108, %114 : vector<9x6xf32>
      %c2_i32_126 = arith.constant 2 : i32
      %116 = arith.addi %arg14, %c2_i32_126 : i32
      %117 = arith.index_cast %116 : i32 to index
      %c1_127 = arith.constant 1 : index
      %c0_128 = arith.constant 0 : index
      %118 = vector.load %arg13[%117, %c1_127, %c0_128] : memref<11x11x4xf32, #tpu.memory_space<vmem>>, vector<1x9x4xf32>
      %119 = vector.shape_cast %118 : vector<1x9x4xf32> to vector<9x4xf32>
      %120 = arith.truncf %119 : vector<9x4xf32> to vector<9x4xbf16>
      %cst_129 = arith.constant dense<0.000000e+00> : vector<9x6xf32>
      %121 = tpu.matmul %120, %55, %cst_129 {dimension_numbers = #tpu.dot_dimension_numbers<[1], [0], [0], [1], [0, 0, 1, 1], [], []>} : vector<9x4xbf16>, vector<4x6xbf16>, vector<9x6xf32> -> vector<9x6xf32>
      %122 = arith.addf %115, %121 : vector<9x6xf32>
      %c2_i32_130 = arith.constant 2 : i32
      %123 = arith.addi %arg14, %c2_i32_130 : i32
      %124 = arith.index_cast %123 : i32 to index
      %c2_131 = arith.constant 2 : index
      %c0_132 = arith.constant 0 : index
      %125 = vector.load %arg13[%124, %c2_131, %c0_132] : memref<11x11x4xf32, #tpu.memory_space<vmem>>, vector<1x9x4xf32>
      %126 = vector.shape_cast %125 : vector<1x9x4xf32> to vector<9x4xf32>
      %127 = arith.truncf %126 : vector<9x4xf32> to vector<9x4xbf16>
      %cst_133 = arith.constant dense<0.000000e+00> : vector<9x6xf32>
      %128 = tpu.matmul %127, %57, %cst_133 {dimension_numbers = #tpu.dot_dimension_numbers<[1], [0], [0], [1], [0, 0, 1, 1], [], []>} : vector<9x4xbf16>, vector<4x6xbf16>, vector<9x6xf32> -> vector<9x6xf32>
      %129 = arith.addf %122, %128 : vector<9x6xf32>
      %130 = vector.broadcast %61 : vector<1x6xf32> to vector<9x6xf32>
      %131 = arith.mulf %129, %130 : vector<9x6xf32>
      %132 = vector.broadcast %62 : vector<1x6xf32> to vector<9x6xf32>
      %133 = arith.addf %131, %132 : vector<9x6xf32>
      %cst_134 = arith.constant 0.000000e+00 : f32
      %134 = vector.broadcast %cst_134 : f32 to vector<9x6xf32>
      %135 = arith.maximumf %133, %134 : vector<9x6xf32>
      %c0_135 = arith.constant 0 : index
      %136 = arith.index_cast %arg14 : i32 to index
      %c0_136 = arith.constant 0 : index
      %c0_137 = arith.constant 0 : index
      %137 = vector.load %arg11[%c0_135, %136, %c0_136, %c0_137] : memref<1x9x9x6xf32, #tpu.memory_space<vmem>>, vector<1x1x9x6xf32>
      %138 = vector.shape_cast %137 : vector<1x1x9x6xf32> to vector<9x6xf32>
      %139 = vector.shape_cast %135 : vector<9x6xf32> to vector<1x1x9x6xf32>
      tpu.vector_store %arg11[%c0_135, %136, %c0_136, %c0_137], %139 {strides = array<i32>} : memref<1x9x9x6xf32, #tpu.memory_space<vmem>>, vector<1x1x9x6xf32>,
    }
    %c9_i32_97 = arith.constant 9 : i32
    return
  }
  func.func @transform_0(%arg0: i32) -> (i32, i32, i32, i32) {
    %c0_i32 = arith.constant 0 : i32
    %c0_i32_0 = arith.constant 0 : i32
    %c0_i32_1 = arith.constant 0 : i32
    %c0_i32_2 = arith.constant 0 : i32
    return %arg0, %c0_i32, %c0_i32_0, %c0_i32_1 : i32, i32, i32, i32
  }
  func.func @transform_1(%arg0: i32) -> (i32, i32, i32, i32) {
    %c0_i32 = arith.constant 0 : i32
    %c0_i32_0 = arith.constant 0 : i32
    %c0_i32_1 = arith.constant 0 : i32
    %c0_i32_2 = arith.constant 0 : i32
    return %arg0, %c0_i32, %c0_i32_0, %c0_i32_1 : i32, i32, i32, i32
  }
  func.func @transform_2(%arg0: i32) -> (i32, i32, i32) {
    %c0_i32 = arith.constant 0 : i32
    %c0_i32_0 = arith.constant 0 : i32
    %c0_i32_1 = arith.constant 0 : i32
    %c0_i32_2 = arith.constant 0 : i32
    return %c0_i32, %c0_i32_0, %c0_i32_1 : i32, i32, i32
  }
  func.func @transform_3(%arg0: i32) -> (i32, i32, i32) {
    %c0_i32 = arith.constant 0 : i32
    %c0_i32_0 = arith.constant 0 : i32
    %c0_i32_1 = arith.constant 0 : i32
    %c0_i32_2 = arith.constant 0 : i32
    return %c0_i32, %c0_i32_0, %c0_i32_1 : i32, i32, i32
  }
  func.func @transform_4(%arg0: i32) -> (i32, i32, i32) {
    %c0_i32 = arith.constant 0 : i32
    %c0_i32_0 = arith.constant 0 : i32
    %c0_i32_1 = arith.constant 0 : i32
    %c0_i32_2 = arith.constant 0 : i32
    return %c0_i32, %c0_i32_0, %c0_i32_1 : i32, i32, i32
  }
  func.func @transform_5(%arg0: i32) -> (i32, i32) {
    %c0_i32 = arith.constant 0 : i32
    %c0_i32_0 = arith.constant 0 : i32
    %c0_i32_1 = arith.constant 0 : i32
    return %c0_i32, %c0_i32_0 : i32, i32
  }
  func.func @transform_6(%arg0: i32) -> (i32, i32) {
    %c0_i32 = arith.constant 0 : i32
    %c0_i32_0 = arith.constant 0 : i32
    %c0_i32_1 = arith.constant 0 : i32
    return %c0_i32, %c0_i32_0 : i32, i32
  }
  func.func @transform_7(%arg0: i32) -> (i32, i32) {
    %c0_i32 = arith.constant 0 : i32
    %c0_i32_0 = arith.constant 0 : i32
    %c0_i32_1 = arith.constant 0 : i32
    return %c0_i32, %c0_i32_0 : i32, i32
  }
  func.func @transform_8(%arg0: i32) -> (i32, i32) {
    %c0_i32 = arith.constant 0 : i32
    %c0_i32_0 = arith.constant 0 : i32
    %c0_i32_1 = arith.constant 0 : i32
    return %c0_i32, %c0_i32_0 : i32, i32
  }
  func.func @transform_9(%arg0: i32) -> (i32, i32) {
    %c0_i32 = arith.constant 0 : i32
    %c0_i32_0 = arith.constant 0 : i32
    %c0_i32_1 = arith.constant 0 : i32
    return %c0_i32, %c0_i32_0 : i32, i32
  }
  func.func @transform_10(%arg0: i32) -> (i32, i32, i32, i32) {
    %c0_i32 = arith.constant 0 : i32
    %c0_i32_0 = arith.constant 0 : i32
    %c0_i32_1 = arith.constant 0 : i32
    %c0_i32_2 = arith.constant 0 : i32
    return %arg0, %c0_i32, %c0_i32_0, %c0_i32_1 : i32, i32, i32, i32
  }
}

</mosaic_0001>

<bundles_post_ra>
// kernel: unet_up2_forward.1
= control target key start
LH: loop header
LB: loop body
LE: loop exit
PB: predicated region body
PF: predicated region fallthrough
CT: control target
= control target key end

     0   :  { %s1664_s13 = smov 0   ;;  %s2125_s0 = inlined_call_operand.vmem [shape: bf16[2,11,11,8], index: 0, kind: input, shape index: {}]   ;;  %s2126_s1 = inlined_call_operand.vmem [shape: bf16[2,9,9,4], index: 1, kind: input, shape index: {}]   ;;  %s2127_s2 = inlined_call_operand.vmem [shape: bf16[9,8,4], index: 2, kind: input, shape index: {}]   ;;  %s2128_s3 = inlined_call_operand.vmem [shape: bf16[9,4,4], index: 3, kind: input, shape index: {}]   ;;  %s2129_s4 = inlined_call_operand.vmem [shape: bf16[9,4,6], index: 4, kind: input, shape index: {}]   ;;  %s2130_s5 = inlined_call_operand.vmem [shape: f32[1,4], index: 5, kind: input, shape index: {}]   ;;  %s2131_s6 = inlined_call_operand.vmem [shape: f32[1,4], index: 6, kind: input, shape index: {}]   ;;  %s2132_s7 = inlined_call_operand.vmem [shape: f32[1,4], index: 7, kind: input, shape index: {}]   ;;  %s2133_s8 = inlined_call_operand.vmem [shape: f32[1,6], index: 8, kind: input, shape index: {}]   ;;  %s2134_s9 = inlined_call_operand.vmem [shape: f32[1,6], index: 9, kind: input, shape index: {}]   ;;  %s2135_s10 = inlined_call_operand.vmem [shape: f32[2,9,9,6], index: 10, kind: output, shape index: {}]  }
   0x1 LB: > { %s1398_s14 = sadd.s32 4294967295, %s1594_s13   ;;  %p1402_p0 = scmp.ge.s32.totalorder %s1594_s13, 1  ;;  %s1594_s13 = sphi %s1664_s13, %s20_s13  }
   0x2   : > { %p322_p1 = scmp.lt.s32.totalorder %s1594_s13, 3 }
   0x4   : > { %p323_p2 = pnand %p1402_p0, %p322_p1 }
   0x5   : > { %p365_p3 = scmp.lt.s32.totalorder (!%p323_p2), %s1398_s14, 1  ;;  %s1935_s27 = smov (!%p323_p2), 0  }
   0x6   : > { %326 = sbr.rel (%p323_p2) target bundleno = 612 (0x264), region = 60 }
   0xb   : > { %vm381_vm0 = vcmask 31744   ;;  %v1608_v0 = vmov 0.0   ;;  %s2137_s14 = smov (!%p365_p3, %s1398_s14), 1  ;;  %v1714_v1 = vld [vmem:[%s2127_s2] sm:$0xf]  ;;  %vm383_vm1 = vcmask 26624  }
   0xc   : > { %382 = vst.msk [vmem:[#allocation2] sm:$0xff] %vm381_vm0, %v1608_v0  ;;  %s1540_s15 = smul.u32 88, %s2137_s14  ;;  %v1719_v2 = vld [vmem:[%s2127_s2 + $0x4] sm:$0xf]  ;;  %v1726_v3 = vld [vmem:[%s2127_s2 + $0x8] sm:$0xf] }
   0xd   : > { %385 = vst.msk [vmem:[#allocation2 + $0x10] sm:$0xff] %vm381_vm0, %v1608_v0  ;;  %s1541_s16 = smul.u32 72, %s2137_s14  ;;  %v1731_v4 = vld [vmem:[%s2127_s2 + $0xc] sm:$0xf]  ;;  %v1738_v5 = vld [vmem:[%s2127_s2 + $0x10] sm:$0xf] }
   0xe   : > { %387 = vst.msk [vmem:[#allocation2 + $0x20] sm:$0xff] %vm381_vm0, %v1608_v0  ;;  %s1685_s19 = scalar_lea.vmem %s2125_s0, %s1540_s15  ;;  %s1542_s20 = smul.u32 144, %s2137_s14  ;;  %v1743_v6 = vld [vmem:[%s2127_s2 + $0x14] sm:$0xf]  ;;  %v1750_v7 = vld [vmem:[%s2127_s2 + $0x18] sm:$0xf] }
   0xf   : > { %389 = vst.msk [vmem:[#allocation2 + $0x30] sm:$0xff] %vm381_vm0, %v1608_v0  ;;  %s1692_s23 = scalar_lea.vmem %s2126_s1, %s1541_s16  ;;  %v1755_v8 = vld [vmem:[%s2127_s2 + $0x1c] sm:$0xf]  ;;  %v1762_v9 = vld [vmem:[%s2127_s2 + $0x20] sm:$0xf] }
  0x10   : > { %391 = vst.msk [vmem:[#allocation2 + $0x40] sm:$0xff] %vm381_vm0, %v1608_v0  ;;  %s1699_s26 = scalar_lea.vmem %s2135_s10, %s1542_s20  ;;  %v1767_v10 = vld [vmem:[%s2128_s3] sm:$0x3]  ;;  %v1774_v11 = vld [vmem:[%s2128_s3 + $0x2] sm:$0x3] }
  0x11   : > { %393 = vst.msk [vmem:[#allocation2 + $0x50] sm:$0xff] %vm381_vm0, %v1608_v0  ;;  %v1779_v12 = vld [vmem:[%s2128_s3 + $0x4] sm:$0x3]  ;;  %v1786_v13 = vld [vmem:[%s2128_s3 + $0x6] sm:$0x3] }
  0x12   : > { %395 = vst.msk [vmem:[#allocation2 + $0x60] sm:$0xff] %vm381_vm0, %v1608_v0  ;;  %v1791_v14 = vld [vmem:[%s2128_s3 + $0x8] sm:$0x3]  ;;  %v1798_v15 = vld [vmem:[%s2128_s3 + $0xa] sm:$0x3] }
  0x13   : > { %397 = vst.msk [vmem:[#allocation2 + $0x70] sm:$0xff] %vm381_vm0, %v1608_v0  ;;  %v1803_v16 = vld [vmem:[%s2128_s3 + $0xc] sm:$0x3]  ;;  %v1810_v17 = vld [vmem:[%s2128_s3 + $0xe] sm:$0x3] }
  0x14   : > { %399 = vst.msk [vmem:[#allocation2 + $0x80] sm:$0xff] %vm381_vm0, %v1608_v0  ;;  %v1815_v18 = vld [vmem:[%s2128_s3 + $0x10] sm:$0x3]  ;;  %v1822_v19 = vld [vmem:[%s2129_s4] sm:$0x3] }
  0x15   : > { %401 = vst.msk [vmem:[#allocation2 + $0x90] sm:$0xff] %vm381_vm0, %v1608_v0  ;;  %v1827_v20 = vld [vmem:[%s2129_s4 + $0x2] sm:$0x3]  ;;  %v1834_v21 = vld [vmem:[%s2129_s4 + $0x4] sm:$0x3] }
  0x16   : > { %403 = vst.msk [vmem:[#allocation2 + $0xa0] sm:$0xff] %vm381_vm0, %v1608_v0  ;;  %v1839_v22 = vld [vmem:[%s2129_s4 + $0x6] sm:$0x3]  ;;  %v1846_v23 = vld [vmem:[%s2129_s4 + $0x8] sm:$0x3] }
  0x17   : > { %405 = vst.msk [vmem:[#allocation3] sm:$0xff] %vm381_vm0, %v1608_v0  ;;  %v1851_v24 = vld [vmem:[%s2129_s4 + $0xa] sm:$0x3]  ;;  %v1858_v25 = vld [vmem:[%s2129_s4 + $0xc] sm:$0x3] }
  0x18   : > { %407 = vst.msk [vmem:[#allocation3 + $0x10] sm:$0xff] %vm381_vm0, %v1608_v0  ;;  %v1863_v26 = vld [vmem:[%s2129_s4 + $0xe] sm:$0x3]  ;;  %v1870_v27 = vld [vmem:[%s2129_s4 + $0x10] sm:$0x3] }
  0x19   : > { %409 = vst.msk [vmem:[#allocation3 + $0x20] sm:$0xff] %vm381_vm0, %v1608_v0  ;;  %v1875_v28 = vld [vmem:[%s2130_s5] sm:$0x1] }
  0x1a   : > { %411 = vst.msk [vmem:[#allocation3 + $0x30] sm:$0xff] %vm381_vm0, %v1608_v0  ;;  %v1882_v29 = vld [vmem:[%s2131_s6] sm:$0x1] }
  0x1b   : > { %413 = vst.msk [vmem:[#allocation3 + $0x40] sm:$0xff] %vm381_vm0, %v1608_v0  ;;  %v1887_v30 = vld [vmem:[%s2132_s7] sm:$0x1] }
  0x1c   : > { %415 = vst.msk [vmem:[#allocation3 + $0x50] sm:$0xff] %vm381_vm0, %v1608_v0  ;;  %v1894_v31 = vld [vmem:[%s2133_s8] sm:$0x1] }
  0x1d   : > { %417 = vst.msk [vmem:[#allocation3 + $0x60] sm:$0xff] %vm381_vm0, %v1608_v0  ;;  %v1899_v32 = vld [vmem:[%s2134_s9] sm:$0x1] }
  0x1e   : > { %419 = vst.msk [vmem:[#allocation3 + $0x70] sm:$0xff] %vm381_vm0, %v1608_v0 }
  0x1f   : > { %421 = vst.msk [vmem:[#allocation3 + $0x80] sm:$0xff] %vm381_vm0, %v1608_v0 }
  0x20   : > { %423 = vst.msk [vmem:[#allocation3 + $0x90] sm:$0xff] %vm381_vm0, %v1608_v0 }
  0x21   : > { %425 = vst.msk [vmem:[#allocation3 + $0xa0] sm:$0xff] %vm381_vm0, %v1608_v0 }
  0x22   : > { %384 = vst.msk [vmem:[#allocation2 + $0x8] sm:$0x7] %vm383_vm1, %v1608_v0 }
  0x23   : > { %386 = vst.msk [vmem:[#allocation2 + $0x18] sm:$0x7] %vm383_vm1, %v1608_v0 }
  0x24   : > { %388 = vst.msk [vmem:[#allocation2 + $0x28] sm:$0x7] %vm383_vm1, %v1608_v0 }
  0x25   : > { %390 = vst.msk [vmem:[#allocation2 + $0x38] sm:$0x7] %vm383_vm1, %v1608_v0 }
  0x26   : > { %392 = vst.msk [vmem:[#allocation2 + $0x48] sm:$0x7] %vm383_vm1, %v1608_v0 }
  0x27   : > { %394 = vst.msk [vmem:[#allocation2 + $0x58] sm:$0x7] %vm383_vm1, %v1608_v0 }
  0x28   : > { %396 = vst.msk [vmem:[#allocation2 + $0x68] sm:$0x7] %vm383_vm1, %v1608_v0 }
  0x29   : > { %398 = vst.msk [vmem:[#allocation2 + $0x78] sm:$0x7] %vm383_vm1, %v1608_v0 }
  0x2a   : > { %400 = vst.msk [vmem:[#allocation2 + $0x88] sm:$0x7] %vm383_vm1, %v1608_v0 }
  0x2b   : > { %402 = vst.msk [vmem:[#allocation2 + $0x98] sm:$0x7] %vm383_vm1, %v1608_v0 }
  0x2c   : > { %404 = vst.msk [vmem:[#allocation2 + $0xa8] sm:$0x7] %vm383_vm1, %v1608_v0 }
  0x2d   : > { %406 = vst.msk [vmem:[#allocation3 + $0x8] sm:$0x7] %vm383_vm1, %v1608_v0 }
  0x2e   : > { %408 = vst.msk [vmem:[#allocation3 + $0x18] sm:$0x7] %vm383_vm1, %v1608_v0 }
  0x2f   : > { %410 = vst.msk [vmem:[#allocation3 + $0x28] sm:$0x7] %vm383_vm1, %v1608_v0 }
  0x30   : > { %412 = vst.msk [vmem:[#allocation3 + $0x38] sm:$0x7] %vm383_vm1, %v1608_v0 }
  0x31   : > { %414 = vst.msk [vmem:[#allocation3 + $0x48] sm:$0x7] %vm383_vm1, %v1608_v0 }
  0x32   : > { %416 = vst.msk [vmem:[#allocation3 + $0x58] sm:$0x7] %vm383_vm1, %v1608_v0 }
  0x33   : > { %418 = vst.msk [vmem:[#allocation3 + $0x68] sm:$0x7] %vm383_vm1, %v1608_v0 }
  0x34   : > { %420 = vst.msk [vmem:[#allocation3 + $0x78] sm:$0x7] %vm383_vm1, %v1608_v0 }
  0x35   : > { %422 = vst.msk [vmem:[#allocation3 + $0x88] sm:$0x7] %vm383_vm1, %v1608_v0 }
  0x36   : > { %424 = vst.msk [vmem:[#allocation3 + $0x98] sm:$0x7] %vm383_vm1, %v1608_v0 }
  0x37   : > { %426 = vst.msk [vmem:[#allocation3 + $0xa8] sm:$0x7] %vm383_vm1, %v1608_v0 }
  0x38 LB: >> { %vm510_vm2 = vcmask 1043456   ;;  %s1532_s28 = sshll.u32 %s1598_s27, 3  ;;  %vm506_vm3 = vcmask 64512   ;;  %s1476_s11 = sshll.u32 %s1598_s27, 4  ;;  %vm775_vm4 = vcmask 24576   ;;  %s1598_s27 = sphi %s1935_s27, %s488_s27  }
  0x39   : >> { %v559_v33 = vsel %vm510_vm2, %v1726_v3, 0  ;;  %v592_v34 = vsel %vm510_vm2, %v1731_v4, 0  ;;  %v512_v35 = vsel %vm510_vm2, %v1719_v2, 0  ;;  %v531_v36 = vsel %vm510_vm2, %v1714_v1, 0  ;;  %s1960_s29 = scalar_lea.vmem %s1685_s19, %s1532_s28  ;;  %s765_s30 = scalar_lea.vmem %s1692_s23, %s1532_s28 }
  0x3a   : >> { %568 = vmatpush.bf16.msra.mxu2 %v559_v33  ;;  %601 = vmatpush.bf16.msra.mxu3 %v592_v34  ;;  %v620_v37 = vsel %vm510_vm2, %v1738_v5, 0  ;;  %v683_v38 = vsel %vm510_vm2, %v1750_v7, 0  ;;  %v711_v39 = vsel %vm510_vm2, %v1755_v8, 0  ;;  %v650_v40 = vsel %vm510_vm2, %v1743_v6, 0  ;;  %v1440_v41 = vld [vmem:[%s1960_s29] sm:$0xe] }
  0x3b   : >> { %521 = vmatpush.bf16.msra.mxu0 %v512_v35  ;;  %540 = vmatpush.bf16.msra.mxu1 %v531_v36  ;;  %v1534_v42 = vld [vmem:[%s1960_s29] sm:$0x30]  ;;  %v1448_v43 = vld [vmem:[%s1960_s29 + $0x8] sm:$0xf]  ;;  %v1535_v45 = vld [vmem:[%s1960_s29 + $0x8] sm:$0x10] }
  0x3c   : >> { %v1441_v44 = vor.u32 %v1534_v42, %v1440_v41  ;;  %v1434_v46 = vld [vmem:[%s1960_s29] sm:$0xf]  ;;  %v1533_v47 = vld [vmem:[%s1960_s29] sm:$0x10]  ;;  %v1449_v48 = vor.u32 %v1535_v45, %v1448_v43  ;;  %v1464_v50 = vld [vmem:[%s1960_s29 + $0x10] sm:$0xf] }
  0x3d   : >> { %v1435_v49 = vor.u32 %v1533_v47, %v1434_v46  ;;  %v1537_v51 = vld [vmem:[%s1960_s29 + $0x10] sm:$0x10]  ;;  %v741_v59 = vsel %vm510_vm2, %v1762_v9, 0  ;;  %v1456_v60 = vld [vmem:[%s1960_s29 + $0x8] sm:$0xe]  ;;  %s1330_s12 = scalar_lea.vmem [#allocation2], %s1476_s11 }
  0x3e   : >> { %692 = vmatpush.bf16.msrb.mxu2 %v683_v38  ;;  %720 = vmatpush.bf16.msrb.mxu3 %v711_v39  ;;  %v554_v52 = vrot.slane %v1441_v44, 1  ;;  %v1465_v55 = vor.u32 %v1537_v51, %v1464_v50  ;;  %v1536_v61 = vld [vmem:[%s1960_s29 + $0x8] sm:$0x30]  ;;  %v612_v33 = vshll.u32 %v1449_v48, 16  ;;  %v610_v36 = vshrl.u32 %v1449_v48, 16  ;;  %s488_s27 = sadd.s32 1, %s1598_s27  }
  0x3f   : >> { %629 = vmatpush.bf16.msrb.mxu0 %v620_v37  ;;  %659 = vmatpush.bf16.msrb.mxu1 %v650_v40  ;;  %v500_v53 = vshrl.u32 %v1435_v49, 16  ;;  %v502_v54 = vshll.u32 %v1435_v49, 16  ;;  %v1457_v0 = vor.u32 %v1536_v61, %v1456_v60  ;;  %v1472_v39 = vld [vmem:[%s1960_s29 + $0x10] sm:$0xe]  ;;  %v1538_v40 = vld [vmem:[%s1960_s29 + $0x10] sm:$0x30] }
  0x40   : >> { %1450 = vmatmul.msk.bf16.vlgmr.msra.gmra.mxu3 %vm506_vm3, %v1449_v48  ;;  %1437 = vmatmul.msk.bf16.vlgmr.msra.gmra.mxu1 %vm506_vm3, %v1435_v49  ;;  %v703_v58 = vshll.u32 %v1465_v55, 16  ;;  %v701_v62 = vshrl.u32 %v1465_v55, 16  ;;  %v614_v37 = vrot.slane %v612_v33, 1  ;;  %v1473_v41 = vor.u32 %v1538_v40, %v1472_v39  ;;  %p485_p4 = scmp.ge.s32.totalorder %s488_s27, 9  }
  0x41   : >> { %1442 = vmatmul.msk.bf16.vlgmr.msra.gmra.mxu2 %vm506_vm3, %v554_v52  ;;  %v504_v56 = vrot.slane %v502_v54, 1  ;;  %v645_v35 = vrot.slane %v1457_v0, 1  ;;  %s1995_s14 = smov (%p485_p4), 0  }
  0x42   : >> { %v705_v63 = vrot.slane %v703_v58, 1  ;;  %v615_v38 = vor.u32 %v614_v37, %v610_v36  ;;  %v736_v42 = vrot.slane %v1473_v41, 1 }
  0x43   : >> { %v505_v57 = vor.u32 %v504_v56, %v500_v53 }
  0x44   : >> { %v706_v34 = vor.u32 %v705_v63, %v701_v62 }
  0x45   : >> { %1436 = vmatmul.msk.bf16.vlgmr.msra.gmra.mxu0 %vm506_vm3, %v505_v57 }
  0x46   : >> { %750 = vmatpush.bf16.msra.mxu0 %v741_v59 }
  0x50   : >> { %1467 = vmatmul.msk.bf16.vlgmr.msrb.gmra.mxu3 %vm506_vm3, %v706_v34  ;;  %1458 = vmatmul.msk.bf16.vlgmr.msrb.gmra.mxu1 %vm506_vm3, %v645_v35  ;;  %v766_v35 = vld [vmem:[%s765_s30] sm:$0xf] }
  0x51   : >> { %1466 = vmatmul.msk.bf16.vlgmr.msrb.gmra.mxu2 %vm506_vm3, %v1465_v55 }
  0x55   : >> { %1451 = vmatmul.msk.bf16.vlgmr.msrb.gmra.mxu0 %vm506_vm3, %v615_v38  ;;  %v760_v38 = vperm.slane %v1875_v28, 0 }
  0x65   : >> { %1474 = vmatmul.msk.bf16.vlgmr.msra.gmra.mxu0 %vm506_vm3, %v736_v42  ;;  %v768_v42 = vunpack.c.l.bf16 %v766_v35 }
  0xbd   : >> { %v542_v44 = vpop.f32.mrf.mxu1 }
  0xc2   : >> { %v523_v43 = vpop.f32.mrf.mxu0 }
  0xc3   : >> { %v603_v46 = vpop.f32.mrf.mxu3  ;;  %v543_v48 = vadd.f32 %v542_v44, %v523_v43 }
  0xc4   : >> { %v570_v45 = vpop.f32.mrf.mxu2 }
  0xc5   : >> { %v544_v49 = vpop.f32.mrf.mxu1  ;;  %v575_v50 = vadd.f32 %v570_v45, %v543_v48 }
  0xc7   : >> { %v608_v53 = vadd.f32 %v603_v46, %v575_v50 }
  0xca   : >> { %v525_v47 = vpop.f32.mrf.mxu0 }
  0xcb   : >> { %v545_v54 = vadd.f32 %v544_v49, %v525_v47  ;;  %v605_v55 = vpop.f32.mrf.mxu3  ;;  %v767_v47 = vld [vmem:[%s765_s30 + $0x4] sm:$0x1] }
  0xcc   : >> { %v572_v51 = vpop.f32.mrf.mxu2 }
  0xcd   : >> { %v661_v56 = vpop.f32.mrf.mxu1  ;;  %v576_v58 = vadd.f32 %v572_v51, %v545_v54  ;;  %v769_v51 = vunpack.c.l.bf16 %v767_v47 }
  0xcf   : >> { %v609_v62 = vadd.f32 %v605_v55, %v576_v58 }
  0xd2   : >> { %v631_v52 = vpop.f32.mrf.mxu0 }
  0xd3   : >> { %v636_v57 = vadd.f32 %v631_v52, %v608_v53  ;;  %v722_v63 = vpop.f32.mrf.mxu3 }
  0xd4   : >> { %v694_v59 = vpop.f32.mrf.mxu2 }
  0xd5   : >> { %v666_v60 = vadd.f32 %v661_v56, %v636_v57  ;;  %v663_v34 = vpop.f32.mrf.mxu1 }
  0xd7   : >> { %v699_v0 = vadd.f32 %v694_v59, %v666_v60 }
  0xd9   : >> { %v727_v36 = vadd.f32 %v722_v63, %v699_v0 }
  0xda   : >> { %v633_v61 = vpop.f32.mrf.mxu0 }
  0xdb   : >> { %v637_v33 = vadd.f32 %v633_v61, %v609_v62  ;;  %v724_v45 = vpop.f32.mrf.mxu3 }
  0xdc   : >> { %v696_v39 = vpop.f32.mrf.mxu2 }
  0xdd   : >> { %v667_v37 = vadd.f32 %v663_v34, %v637_v33 }
  0xdf   : >> { %v700_v43 = vadd.f32 %v696_v39, %v667_v37 }
  0xe1   : >> { %v728_v48 = vadd.f32 %v724_v45, %v700_v43 }
  0xe2   : >> { %v752_v40 = vpop.f32.mrf.mxu0 }
  0xe3   : >> { %v757_v41 = vadd.f32 %v752_v40, %v727_v36 }
  0xe5   : >> { %v762_v44 = vadd.f32 %v760_v38, %v757_v41 }
  0xe7   : >> { %v770_v46 = vadd.f32 %v768_v42, %v762_v44 }
  0xe9   : >> { %1477 = vst.msk [vmem:[%s1330_s12 + $0x11] sm:$0xff] %vm381_vm0, %v770_v46 }
  0xea   : >> { %v754_v49 = vpop.f32.mrf.mxu0 }
  0xeb   : >> { %v758_v50 = vadd.f32 %v754_v49, %v728_v48 }
  0xed   : >> { %v763_v52 = vadd.f32 %v760_v38, %v758_v50  ;;  %487 = sbr.rel (!%p485_p4) target bundleno = 56 (0x38), region = 151 }
  0xef   : >> { %v771_v53 = vadd.f32 %v769_v51, %v763_v52 }
  0xf1   : >> { %1478 = vst.msk [vmem:[%s1330_s12 + $0x19] sm:$0x1] %vm775_vm4, %v771_v53 }
  0xf2 LB: >> { %vm794_vm5 = vcmask 1041408   ;;  %s1479_s19 = sshll.u32 %s1602_s14, 4  ;;  %s782_s14 = sadd.s32 1, %s1602_s14   ;;  %s1602_s14 = sphi %s1995_s14, %s782_s14  }
  0xf3   : >> { %v796_v54 = vsel %vm794_vm5, %v1774_v11, 0  ;;  %v816_v55 = vsel %vm794_vm5, %v1767_v10, 0  ;;  %v839_v56 = vsel %vm794_vm5, %v1779_v12, 0  ;;  %v867_v1 = vsel %vm794_vm5, %v1786_v13, 0  ;;  %s2019_s23 = scalar_lea.vmem [#allocation2], %s1479_s19  ;;  %s1341_s15 = scalar_lea.vmem [#allocation3], %s1479_s19 }
  0xf4   : >> { %805 = vmatpush.bf16.msra.mxu0 %v796_v54  ;;  %825 = vmatpush.bf16.msra.mxu1 %v816_v55  ;;  %v892_v2 = vsel %vm794_vm5, %v1791_v14, 0  ;;  %v945_v3 = vsel %vm794_vm5, %v1803_v16, 0  ;;  %v970_v4 = vsel %vm794_vm5, %v1810_v17, 0  ;;  %v917_v5 = vsel %vm794_vm5, %v1798_v15, 0  ;;  %p779_p5 = scmp.ge.s32.totalorder %s782_s14, 9  }
  0xf5   : >> { %848 = vmatpush.bf16.msra.mxu2 %v839_v56  ;;  %876 = vmatpush.bf16.msra.mxu3 %v867_v1  ;;  %v995_v63 = vsel %vm794_vm5, %v1815_v18, 0  ;;  %s2059_s16 = smov (%p779_p5), 0  }
  0xf8   : >> { %v788_v6 = vld [vmem:[%s2019_s23 + $0x1] sm:$0xff]  ;;  %v789_v7 = vld [vmem:[%s2019_s23 + $0x9] sm:$0x1]  ;;  %901 = vmatpush.bf16.msrb.mxu0 %v892_v2  ;;  %v833_v58 = vld [vmem:[%s2019_s23 + $0xa] sm:$0x1]  ;;  %926 = vmatpush.bf16.msrb.mxu1 %v917_v5 }
  0xf9   : >> { %v785_v8 = vld [vmem:[%s2019_s23] sm:$0xff]  ;;  %954 = vmatpush.bf16.msrb.mxu2 %v945_v3  ;;  %v790_v9 = vpack.c.bf16 %v789_v7, %v788_v6  ;;  %v786_v28 = vld [vmem:[%s2019_s23 + $0x8] sm:$0x1]  ;;  %979 = vmatpush.bf16.msrb.mxu3 %v970_v4  ;;  %v1484_v61 = vld [vmem:[%s2019_s23 + $0x10] sm:$0xff] }
  0xfa   : >> { %v832_v57 = vld [vmem:[%s2019_s23 + $0x2] sm:$0xff]  ;;  %v787_v59 = vpack.c.bf16 %v786_v28, %v785_v8  ;;  %v1485_v62 = vld [vmem:[%s2019_s23 + $0x18] sm:$0x1]  ;;  %v1488_v34 = vld [vmem:[%s2019_s23 + $0x19] sm:$0x1] }
  0xfb   : >> { %v834_v60 = vpack.c.bf16 %v833_v58, %v832_v57  ;;  %1480 = vmatmul.msk.bf16.vlgmr.msra.gmra.mxu0 %vm381_vm0, %v790_v9  ;;  %v862_v0 = vpack.c.bf16 %v1485_v62, %v1484_v61  ;;  %v1487_v33 = vld [vmem:[%s2019_s23 + $0x11] sm:$0xff]  ;;  %v1494_v35 = vld [vmem:[%s2019_s23 + $0x20] sm:$0xff]  ;;  %v1495_v36 = vld [vmem:[%s2019_s23 + $0x28] sm:$0x1] }
  0xfc   : >> { %1481 = vmatmul.msk.bf16.vlgmr.msra.gmra.mxu1 %vm381_vm0, %v787_v59  ;;  %1004 = vmatpush.bf16.msra.mxu0 %v995_v63  ;;  %v1490_v37 = vld [vmem:[%s2019_s23 + $0x12] sm:$0xff]  ;;  %v1491_v38 = vld [vmem:[%s2019_s23 + $0x1a] sm:$0x1]  ;;  %v1497_v39 = vld [vmem:[%s2019_s23 + $0x21] sm:$0xff]  ;;  %v887_v41 = vpack.c.bf16 %v1488_v34, %v1487_v33  ;;  %v940_v42 = vpack.c.bf16 %v1495_v36, %v1494_v35  ;;  %v1014_v63 = vperm.slane %v1882_v29, 0  ;;  %v1019_v36 = vperm.slane %v1887_v30, 0 }
  0xfd   : >> { %1482 = vmatmul.msk.bf16.vlgmr.msra.gmra.mxu2 %vm381_vm0, %v834_v60  ;;  %1486 = vmatmul.msk.bf16.vlgmr.msra.gmra.mxu3 %vm381_vm0, %v862_v0  ;;  %v1498_v40 = vld [vmem:[%s2019_s23 + $0x29] sm:$0x1]  ;;  %v912_v43 = vpack.c.bf16 %v1491_v38, %v1490_v37  ;;  %v1501_v46 = vld [vmem:[%s2019_s23 + $0x2a] sm:$0x1] }
  0xfe   : >> { %v965_v44 = vpack.c.bf16 %v1498_v40, %v1497_v39  ;;  %v1500_v45 = vld [vmem:[%s2019_s23 + $0x22] sm:$0xff] }
  0xff   : >> { %v990_v47 = vpack.c.bf16 %v1501_v46, %v1500_v45 }
 0x10b   : >> { %1489 = vmatmul.msk.bf16.vlgmr.msrb.gmra.mxu0 %vm381_vm0, %v887_v41 }
 0x10c   : >> { %1492 = vmatmul.msk.bf16.vlgmr.msrb.gmra.mxu1 %vm381_vm0, %v912_v43 }
 0x10d   : >> { %1496 = vmatmul.msk.bf16.vlgmr.msrb.gmra.mxu2 %vm381_vm0, %v940_v42  ;;  %1499 = vmatmul.msk.bf16.vlgmr.msrb.gmra.mxu3 %vm381_vm0, %v965_v44 }
 0x11b   : >> { %1502 = vmatmul.msk.bf16.vlgmr.msra.gmra.mxu0 %vm381_vm0, %v990_v47 }
 0x178   : >> { %v807_v48 = vpop.f32.mrf.mxu0 }
 0x179   : >> { %v827_v49 = vpop.f32.mrf.mxu1 }
 0x17a   : >> { %v828_v54 = vadd.f32 %v827_v49, %v807_v48 }
 0x180   : >> { %v850_v50 = vpop.f32.mrf.mxu2  ;;  %v878_v51 = vpop.f32.mrf.mxu3 }
 0x181   : >> { %v809_v52 = vpop.f32.mrf.mxu0  ;;  %v829_v53 = vpop.f32.mrf.mxu1  ;;  %v855_v55 = vadd.f32 %v850_v50, %v828_v54 }
 0x182   : >> { %v830_v5 = vadd.f32 %v829_v53, %v809_v52 }
 0x183   : >> { %v883_v3 = vadd.f32 %v878_v51, %v855_v55 }
 0x188   : >> { %v852_v56 = vpop.f32.mrf.mxu2  ;;  %v880_v2 = vpop.f32.mrf.mxu3 }
 0x189   : >> { %v903_v1 = vpop.f32.mrf.mxu0  ;;  %v928_v4 = vpop.f32.mrf.mxu1  ;;  %v856_v7 = vadd.f32 %v852_v56, %v830_v5 }
 0x18a   : >> { %v908_v6 = vadd.f32 %v903_v1, %v883_v3 }
 0x18b   : >> { %v884_v57 = vadd.f32 %v880_v2, %v856_v7 }
 0x18c   : >> { %v933_v28 = vadd.f32 %v928_v4, %v908_v6 }
 0x190   : >> { %v956_v8 = vpop.f32.mrf.mxu2  ;;  %v981_v59 = vpop.f32.mrf.mxu3 }
 0x191   : >> { %v905_v9 = vpop.f32.mrf.mxu0  ;;  %v961_v58 = vadd.f32 %v956_v8, %v933_v28  ;;  %v930_v61 = vpop.f32.mrf.mxu1 }
 0x192   : >> { %v909_v60 = vadd.f32 %v905_v9, %v884_v57 }
 0x193   : >> { %v986_v62 = vadd.f32 %v981_v59, %v961_v58 }
 0x194   : >> { %v934_v34 = vadd.f32 %v930_v61, %v909_v60 }
 0x198   : >> { %v958_v0 = vpop.f32.mrf.mxu2  ;;  %v983_v40 = vpop.f32.mrf.mxu3 }
 0x199   : >> { %v1006_v33 = vpop.f32.mrf.mxu0  ;;  %v962_v37 = vadd.f32 %v958_v0, %v934_v34 }
 0x19a   : >> { %v1011_v35 = vadd.f32 %v1006_v33, %v986_v62 }
 0x19b   : >> { %v987_v41 = vadd.f32 %v983_v40, %v962_v37 }
 0x19c   : >> { %v1016_v38 = vmul.f32 %v1014_v63, %v1011_v35 }
 0x19e   : >> { %v1021_v39 = vadd.f32 %v1019_v36, %v1016_v38 }
 0x1a0   : >> { %v1023_v42 = vmax.f32 %v1021_v39, 0.0 }
 0x1a1   : >> { %v1008_v43 = vpop.f32.mrf.mxu0 }
 0x1a2   : >> { %1504 = vst.msk [vmem:[%s1341_s15 + $0x11] sm:$0xff] %vm381_vm0, %v1023_v42  ;;  %v1012_v44 = vadd.f32 %v1008_v43, %v987_v41 }
 0x1a4   : >> { %v1017_v45 = vmul.f32 %v1014_v63, %v1012_v44 }
 0x1a6   : >> { %v1022_v46 = vadd.f32 %v1019_v36, %v1017_v45  ;;  %781 = sbr.rel (!%p779_p5) target bundleno = 242 (0xf2), region = 162 }
 0x1a8   : >> { %v1024_v47 = vmax.f32 %v1022_v46, 0.0 }
 0x1aa   : >> { %1505 = vst.msk [vmem:[%s1341_s15 + $0x19] sm:$0x1] %vm775_vm4, %v1024_v47 }
 0x1ab LB: >> { %v1048_v48 = vsel %vm794_vm5, %v1827_v20, 0  ;;  %v1068_v49 = vsel %vm794_vm5, %v1822_v19, 0  ;;  %v1091_v50 = vsel %vm794_vm5, %v1834_v21, 0  ;;  %v1119_v10 = vsel %vm794_vm5, %v1839_v22, 0  ;;  %s1506_s17 = sshll.u32 %s1606_s16, 4  ;;  %s1034_s16 = sadd.s32 1, %s1606_s16   ;;  %s1606_s16 = sphi %s2059_s16, %s1034_s16  }
 0x1ac   : >> { %1057 = vmatpush.bf16.msra.mxu0 %v1048_v48  ;;  %1077 = vmatpush.bf16.msra.mxu1 %v1068_v49  ;;  %v1144_v11 = vsel %vm794_vm5, %v1846_v23, 0  ;;  %v1197_v12 = vsel %vm794_vm5, %v1858_v25, 0  ;;  %v1222_v13 = vsel %vm794_vm5, %v1863_v26, 0  ;;  %v1169_v14 = vsel %vm794_vm5, %v1851_v24, 0  ;;  %s2083_s18 = scalar_lea.vmem [#allocation3], %s1506_s17  ;;  %s1277_s20 = scalar_lea.vmem %s1699_s26, %s1506_s17 }
 0x1ad   : >> { %1100 = vmatpush.bf16.msra.mxu2 %v1091_v50  ;;  %1128 = vmatpush.bf16.msra.mxu3 %v1119_v10  ;;  %v1247_v56 = vsel %vm794_vm5, %v1870_v27, 0  ;;  %vm1278_vm6 = vcmask 48128   ;;  %vm1280_vm7 = vcmask 40960   ;;  %p1031_p6 = scmp.ge.s32.totalorder %s1034_s16, 9  }
 0x1b0   : >> { %1153 = vmatpush.bf16.msrb.mxu0 %v1144_v11  ;;  %1178 = vmatpush.bf16.msrb.mxu1 %v1169_v14 }
 0x1b1   : >> { %1206 = vmatpush.bf16.msrb.mxu2 %v1197_v12  ;;  %v1040_v15 = vld [vmem:[%s2083_s18 + $0x1] sm:$0xff]  ;;  %v1041_v16 = vld [vmem:[%s2083_s18 + $0x9] sm:$0x1]  ;;  %1231 = vmatpush.bf16.msrb.mxu3 %v1222_v13  ;;  %v1085_v51 = vld [vmem:[%s2083_s18 + $0xa] sm:$0x1] }
 0x1b2   : >> { %v1037_v17 = vld [vmem:[%s2083_s18] sm:$0xff]  ;;  %v1042_v18 = vpack.c.bf16 %v1041_v16, %v1040_v15  ;;  %v1038_v29 = vld [vmem:[%s2083_s18 + $0x8] sm:$0x1]  ;;  %v1511_v54 = vld [vmem:[%s2083_s18 + $0x10] sm:$0xff]  ;;  %v1266_v15 = vperm.slane %v1894_v31, 0 }
 0x1b3   : >> { %v1084_v30 = vld [vmem:[%s2083_s18 + $0x2] sm:$0xff]  ;;  %v1039_v52 = vpack.c.bf16 %v1038_v29, %v1037_v17  ;;  %v1512_v55 = vld [vmem:[%s2083_s18 + $0x18] sm:$0x1]  ;;  %v1515_v3 = vld [vmem:[%s2083_s18 + $0x19] sm:$0x1] }
 0x1b4   : >> { %v1086_v53 = vpack.c.bf16 %v1085_v51, %v1084_v30  ;;  %1507 = vmatmul.msk.bf16.vlgmr.msra.gmra.mxu0 %vm381_vm0, %v1042_v18  ;;  %v1114_v1 = vpack.c.bf16 %v1512_v55, %v1511_v54  ;;  %v1514_v2 = vld [vmem:[%s2083_s18 + $0x11] sm:$0xff]  ;;  %v1521_v4 = vld [vmem:[%s2083_s18 + $0x20] sm:$0xff]  ;;  %v1522_v5 = vld [vmem:[%s2083_s18 + $0x28] sm:$0x1]  ;;  %v1271_v30 = vperm.slane %v1899_v32, 0 }
 0x1b5   : >> { %1508 = vmatmul.msk.bf16.vlgmr.msra.gmra.mxu1 %vm381_vm0, %v1039_v52  ;;  %1256 = vmatpush.bf16.msra.mxu0 %v1247_v56  ;;  %v1517_v6 = vld [vmem:[%s2083_s18 + $0x12] sm:$0xff]  ;;  %v1518_v7 = vld [vmem:[%s2083_s18 + $0x1a] sm:$0x1]  ;;  %v1524_v8 = vld [vmem:[%s2083_s18 + $0x21] sm:$0xff]  ;;  %v1139_v28 = vpack.c.bf16 %v1515_v3, %v1514_v2  ;;  %v1192_v57 = vpack.c.bf16 %v1522_v5, %v1521_v4 }
 0x1b6   : >> { %1509 = vmatmul.msk.bf16.vlgmr.msra.gmra.mxu2 %vm381_vm0, %v1086_v53  ;;  %1513 = vmatmul.msk.bf16.vlgmr.msra.gmra.mxu3 %vm381_vm0, %v1114_v1  ;;  %v1525_v9 = vld [vmem:[%s2083_s18 + $0x29] sm:$0x1]  ;;  %v1164_v58 = vpack.c.bf16 %v1518_v7, %v1517_v6  ;;  %v1528_v61 = vld [vmem:[%s2083_s18 + $0x2a] sm:$0x1] }
 0x1b7   : >> { %v1217_v59 = vpack.c.bf16 %v1525_v9, %v1524_v8  ;;  %v1527_v60 = vld [vmem:[%s2083_s18 + $0x22] sm:$0xff] }
 0x1b8   : >> { %v1242_v62 = vpack.c.bf16 %v1528_v61, %v1527_v60 }
 0x1c4   : >> { %1516 = vmatmul.msk.bf16.vlgmr.msrb.gmra.mxu0 %vm381_vm0, %v1139_v28 }
 0x1c5   : >> { %1519 = vmatmul.msk.bf16.vlgmr.msrb.gmra.mxu1 %vm381_vm0, %v1164_v58 }
 0x1c6   : >> { %1523 = vmatmul.msk.bf16.vlgmr.msrb.gmra.mxu2 %vm381_vm0, %v1192_v57  ;;  %1526 = vmatmul.msk.bf16.vlgmr.msrb.gmra.mxu3 %vm381_vm0, %v1217_v59 }
 0x1d4   : >> { %1529 = vmatmul.msk.bf16.vlgmr.msra.gmra.mxu0 %vm381_vm0, %v1242_v62 }
 0x231   : >> { %v1059_v63 = vpop.f32.mrf.mxu0 }
 0x232   : >> { %v1079_v0 = vpop.f32.mrf.mxu1 }
 0x233   : >> { %v1080_v37 = vadd.f32 %v1079_v0, %v1059_v63 }
 0x239   : >> { %v1102_v33 = vpop.f32.mrf.mxu2  ;;  %v1130_v34 = vpop.f32.mrf.mxu3 }
 0x23a   : >> { %v1061_v35 = vpop.f32.mrf.mxu0  ;;  %v1081_v36 = vpop.f32.mrf.mxu1  ;;  %v1107_v38 = vadd.f32 %v1102_v33, %v1080_v37 }
 0x23b   : >> { %v1082_v44 = vadd.f32 %v1081_v36, %v1061_v35 }
 0x23c   : >> { %v1135_v42 = vadd.f32 %v1130_v34, %v1107_v38 }
 0x241   : >> { %v1104_v39 = vpop.f32.mrf.mxu2  ;;  %v1132_v41 = vpop.f32.mrf.mxu3 }
 0x242   : >> { %v1155_v40 = vpop.f32.mrf.mxu0  ;;  %v1180_v43 = vpop.f32.mrf.mxu1  ;;  %v1108_v46 = vadd.f32 %v1104_v39, %v1082_v44 }
 0x243   : >> { %v1160_v45 = vadd.f32 %v1155_v40, %v1135_v42 }
 0x244   : >> { %v1136_v50 = vadd.f32 %v1132_v41, %v1108_v46 }
 0x245   : >> { %v1185_v49 = vadd.f32 %v1180_v43, %v1160_v45 }
 0x249   : >> { %v1208_v47 = vpop.f32.mrf.mxu2  ;;  %v1233_v11 = vpop.f32.mrf.mxu3 }
 0x24a   : >> { %v1157_v48 = vpop.f32.mrf.mxu0  ;;  %v1213_v10 = vadd.f32 %v1208_v47, %v1185_v49  ;;  %v1182_v13 = vpop.f32.mrf.mxu1 }
 0x24b   : >> { %v1161_v12 = vadd.f32 %v1157_v48, %v1136_v50 }
 0x24c   : >> { %v1238_v14 = vadd.f32 %v1233_v11, %v1213_v10 }
 0x24d   : >> { %v1186_v18 = vadd.f32 %v1182_v13, %v1161_v12 }
 0x251   : >> { %v1210_v16 = vpop.f32.mrf.mxu2  ;;  %v1235_v54 = vpop.f32.mrf.mxu3 }
 0x252   : >> { %v1258_v17 = vpop.f32.mrf.mxu0  ;;  %v1214_v51 = vadd.f32 %v1210_v16, %v1186_v18 }
 0x253   : >> { %v1263_v29 = vadd.f32 %v1258_v17, %v1238_v14 }
 0x254   : >> { %v1239_v55 = vadd.f32 %v1235_v54, %v1214_v51 }
 0x255   : >> { %v1268_v52 = vmul.f32 %v1266_v15, %v1263_v29 }
 0x257   : >> { %v1273_v53 = vadd.f32 %v1271_v30, %v1268_v52 }
 0x259   : >> { %v1275_v56 = vmax.f32 %v1273_v53, 0.0 }
 0x25a   : >> { %v1260_v1 = vpop.f32.mrf.mxu0 }
 0x25b   : >> { %1279 = vst.msk [vmem:[%s1277_s20] sm:$0xff] %vm1278_vm6, %v1275_v56  ;;  %v1264_v2 = vadd.f32 %v1260_v1, %v1239_v55 }
 0x25d   : >> { %v1269_v3 = vmul.f32 %v1266_v15, %v1264_v2 }
 0x25f   : >> { %v1274_v4 = vadd.f32 %v1271_v30, %v1269_v3  ;;  %1033 = sbr.rel (!%p1031_p6) target bundleno = 427 (0x1ab), region = 173 }
 0x261   : >> { %v1276_v5 = vmax.f32 %v1274_v4, 0.0 }
 0x263   : >> { %1281 = vst.msk [vmem:[%s1277_s20 + $0x8] sm:$0x1] %vm1280_vm7, %v1276_v5 }
 0x264 PF: > { %s20_s13 = sadd.s32 1, %s1594_s13  }
 0x265   : > { %p17_p7 = scmp.ge.s32.totalorder %s20_s13, 4  }
 0x267   :  { %19 = sbr.rel (!%p17_p7) target bundleno = 1 (0x1), region = 184 }

</bundles_post_ra>
